<compile_context>
chip_gen: v7x
topology: tpu7x:2x2x1
jax: 0.10.0
libtpu: 0.0.40
codegen_flags: <defaults>
</compile_context>

<pallas_src>
import jax
import jax.numpy as jnp
import numpy as np
from jax.experimental import pallas as pl
from jax.experimental.pallas import tpu as pltpu


C_IN, C_OUT = 14, 25
KH, KW = 7, 1
PAD_H, PAD_W = 0, 1
H_IN, W_IN = 15, 47
H_OUT = (H_IN - 1) + KH - 2 * PAD_H          # 21
W_OUT = (W_IN - 1) + KW - 2 * PAD_W          # 45
M = H_OUT * W_OUT                            # 945 (lane-dense output dim)

C_PAD = 16                                   # per-kh channel slab padded 14 -> 16 (2 sublane tiles)
K_PAD = KH * C_PAD                           # 112 (single contraction)
BIAS_COL = C_PAD - 1                         # wt column 15 (= pad channel 15 of kh=0 slab) holds bias
N = C_OUT                                    # 25


def _fused_kernel(w_ref, x_ref, o_ref, a_ref):
    """Fused ReLU + im2col + matmul + bias + SiLU.

    w_ref: (N, K_PAD)        packed weights; column BIAS_COL holds the bias, pad cols are 0.
    x_ref: (C_IN, H_IN*W_IN) raw (pre-ReLU) activation, channel-major rows.
    o_ref: (N, M)            output, lane-dense (M = H_OUT*W_OUT = 945).
    a_ref: (K_PAD, M)        VMEM scratch im2col matrix.
    """
    # Zero the scratch: covers pad channel rows, out-of-window lanes of every slab,
    # and guards against stale VMEM contents (scratch is NOT zero-initialized by Pallas).
    a_ref[...] = jnp.zeros_like(a_ref)

    # Slab kh=0:  a[ci, hi*W_OUT + wo] = relu(x[ci, hi*W_IN + PAD_W + wo])
    # (ReLU + width crop fused into the 15 per-row copies; static lane offsets.)
    for hi in range(H_IN):
        a_ref[pl.ds(0, C_IN), pl.ds(hi * W_OUT, W_OUT)] = jnp.maximum(
            x_ref[:, pl.ds(hi * W_IN + PAD_W, W_OUT)], 0.0)

    # Slabs kh=1..6 are lane-shifted copies of slab 0 (rows 14-15 of `base` are zero),
    # written as full 16-row, sublane-aligned stores at lane offset kh*W_OUT.
    base = a_ref[pl.ds(0, C_PAD), pl.ds(0, H_IN * W_OUT)]          # (16, 675)
    for kh in range(1, KH):
        a_ref[pl.ds(kh * C_PAD, C_PAD), pl.ds(kh * W_OUT, H_IN * W_OUT)] = base

    # Bias row: wt column BIAS_COL carries the bias; drive it with ones across all lanes.
    # (Written AFTER the slab-0 writes so it is not clobbered; other slabs never touch row 15.)
    a_ref[pl.ds(BIAS_COL, 1), :] = jnp.ones((1, M), jnp.float32)

    # Single K=112 contraction on the MXU; bias already folded in.
    v1 = jnp.dot(w_ref[...], a_ref[...], preferred_element_type=jnp.float32)
    o_ref[...] = v1 * jax.nn.sigmoid(v1)                            # v1 * sigmoid(v1)


def _fused_forward(wt, x_rows):
    return pl.pallas_call(
        _fused_kernel,
        out_shape=jax.ShapeDtypeStruct((N, M), jnp.float32),
        grid=(1,),
        in_specs=[
            pl.BlockSpec((N, K_PAD), lambda i: (0, 0)),
            pl.BlockSpec((C_IN, H_IN * W_IN), lambda i: (0, 0)),
        ],
        out_specs=pl.BlockSpec((N, M), lambda i: (0, 0)),
        scratch_shapes=[pltpu.VMEM((K_PAD, M), jnp.float32)],
        compiler_params=pltpu.CompilerParams(
            dimension_semantics=("arbitrary",)),
        cost_estimate=pl.CostEstimate(
            flops=2 * N * K_PAD * M,
            transcendentals=N * M,
            bytes_accessed=(C_IN * H_IN * W_IN + N * K_PAD + N * M) * 4),
    )(wt, x_rows)


def prepare_params(weight, bias):
    """Load-time (once): pack weights for the kernel.

    wt[co, kh*C_PAD + ci] = weight[ci, co, kh, 0] for ci < C_IN; pad columns are zero,
    except column BIAS_COL which holds the bias (driven by the kernel's ones-row).
    """
    w_r = jnp.transpose(weight[..., 0], (1, 2, 0)).astype(jnp.float32)   # (C_OUT, KH, C_IN)
    wt = jnp.zeros((C_OUT, KH, C_PAD), jnp.float32)
    wt = wt.at[:, :, :C_IN].set(w_r)
    wt = wt.reshape(C_OUT, K_PAD)
    wt = wt.at[:, BIAS_COL].set(bias.astype(jnp.float32))
    return wt


def model_forward(x, wt):
    """x: (1, C_IN, H_IN, W_IN) NCHW; wt: (C_OUT, K_PAD) packed weights (bias folded)."""
    # (1, C_IN, H_IN, W_IN) -> (C_IN, H_IN*W_IN): pure row-major collapse (no data movement).
    x_rows = x.reshape(C_IN, H_IN * W_IN).astype(jnp.float32)
    out = _fused_forward(wt, x_rows)                                  # (N, M) = (25, 945)
    # (C_OUT, H_OUT*W_OUT) -> (1, C_OUT, H_OUT, W_OUT): free row-major reshape.
    return out.reshape(1, C_OUT, H_OUT, W_OUT)


def reference_forward(x, weight, bias):
    """Pure-JAX direct transposed-conv reference for validation."""
    x2 = jnp.maximum(x[0], 0.0)                                       # ReLU
    v1 = jnp.zeros((C_OUT, H_OUT, W_OUT), jnp.float32)
    xw = x2[:, :, PAD_W:PAD_W + W_OUT]                                # width crop (kW=1, pad_w=1)
    for kh in range(KH):
        contrib = jnp.einsum('chw,co->ohw', xw, weight[:, :, kh, 0])
        v1 = v1.at[:, kh:kh + H_IN, :].add(contrib)
    v1 = v1 + bias[:, None, None]
    return (v1 * jax.nn.sigmoid(v1))[None, ...]


if __name__ == "__main__":
    key = jax.random.PRNGKey(0)
    kx, kw, kb = jax.random.split(key, 3)

    x1 = jax.random.normal(kx, (1, C_IN, H_IN, W_IN), dtype=jnp.float32)
    # Deterministic parameter init (PyTorch-default-like uniform range).
    fan = C_OUT * KH * KW
    bound = 1.0 / np.sqrt(fan)
    weight = jax.random.uniform(kw, (C_IN, C_OUT, KH, KW), jnp.float32,
                                minval=-bound, maxval=bound)
    bias = jax.random.uniform(kb, (C_OUT,), jnp.float32, minval=-bound, maxval=bound)

    # Weight packing hoisted out of the per-call path (done once at load time).
    wt = prepare_params(weight, bias)

    fwd = jax.jit(model_forward)
    out = jax.block_until_ready(fwd(x1, wt))

    ref = reference_forward(x1, weight, bias)
    assert out.shape == (1, C_OUT, H_OUT, W_OUT), out.shape
    np.testing.assert_allclose(np.asarray(out), np.asarray(ref), rtol=1e-4, atol=1e-4)

    print("KERNEL_OK")
</pallas_src>

<mosaic_0001>
module attributes {stable_mosaic.version = 11 : i64} {
  func.func @_fused_kernel(%arg0: i32, %arg1: memref<25x112xf32, #tpu.memory_space<vmem>>, %arg2: memref<14x705xf32, #tpu.memory_space<vmem>>, %arg3: memref<25x945xf32, #tpu.memory_space<vmem>>, %arg4: memref<112x945xf32, #tpu.memory_space<vmem>>) attributes {dimension_semantics = [#tpu.dimension_semantics<arbitrary>], iteration_bounds = array<i64: 1>, scalar_prefetch = 0 : i64, scratch_operands = 1 : i64, tpu.core_type = #tpu.core_type<tc>, window_params = [{pipeline_mode = #tpu.pipeline_mode<synchronous>, transform_indices = @transform_0, window_bounds = array<i64: 25, 112>}, {pipeline_mode = #tpu.pipeline_mode<synchronous>, transform_indices = @transform_1, window_bounds = array<i64: 14, 705>}, {pipeline_mode = #tpu.pipeline_mode<synchronous>, transform_indices = @transform_2, window_bounds = array<i64: 25, 945>}]} {
    %cst = arith.constant 0.000000e+00 : f32
    %0 = vector.broadcast %cst : f32 to vector<112x945xf32>
    %c0 = arith.constant 0 : index
    %c0_0 = arith.constant 0 : index
    %1 = vector.load %arg4[%c0, %c0_0] : memref<112x945xf32, #tpu.memory_space<vmem>>, vector<112x945xf32>
    tpu.vector_store %arg4[%c0, %c0_0], %0 {strides = array<i32>} : memref<112x945xf32, #tpu.memory_space<vmem>>, vector<112x945xf32>,
    %c0_1 = arith.constant 0 : index
    %c1 = arith.constant 1 : index
    %2 = vector.load %arg2[%c0_1, %c1] : memref<14x705xf32, #tpu.memory_space<vmem>>, vector<14x45xf32>
    %cst_2 = arith.constant 0.000000e+00 : f32
    %3 = vector.broadcast %cst_2 : f32 to vector<14x45xf32>
    %4 = arith.maximumf %2, %3 : vector<14x45xf32>
    %c0_3 = arith.constant 0 : index
    %c0_4 = arith.constant 0 : index
    %5 = vector.load %arg4[%c0_3, %c0_4] : memref<112x945xf32, #tpu.memory_space<vmem>>, vector<14x45xf32>
    tpu.vector_store %arg4[%c0_3, %c0_4], %4 {strides = array<i32>} : memref<112x945xf32, #tpu.memory_space<vmem>>, vector<14x45xf32>,
    %c0_5 = arith.constant 0 : index
    %c48 = arith.constant 48 : index
    %6 = vector.load %arg2[%c0_5, %c48] : memref<14x705xf32, #tpu.memory_space<vmem>>, vector<14x45xf32>
    %cst_6 = arith.constant 0.000000e+00 : f32
    %7 = vector.broadcast %cst_6 : f32 to vector<14x45xf32>
    %8 = arith.maximumf %6, %7 : vector<14x45xf32>
    %c0_7 = arith.constant 0 : index
    %c45 = arith.constant 45 : index
    %9 = vector.load %arg4[%c0_7, %c45] : memref<112x945xf32, #tpu.memory_space<vmem>>, vector<14x45xf32>
    tpu.vector_store %arg4[%c0_7, %c45], %8 {strides = array<i32>} : memref<112x945xf32, #tpu.memory_space<vmem>>, vector<14x45xf32>,
    %c0_8 = arith.constant 0 : index
    %c95 = arith.constant 95 : index
    %10 = vector.load %arg2[%c0_8, %c95] : memref<14x705xf32, #tpu.memory_space<vmem>>, vector<14x45xf32>
    %cst_9 = arith.constant 0.000000e+00 : f32
    %11 = vector.broadcast %cst_9 : f32 to vector<14x45xf32>
    %12 = arith.maximumf %10, %11 : vector<14x45xf32>
    %c0_10 = arith.constant 0 : index
    %c90 = arith.constant 90 : index
    %13 = vector.load %arg4[%c0_10, %c90] : memref<112x945xf32, #tpu.memory_space<vmem>>, vector<14x45xf32>
    tpu.vector_store %arg4[%c0_10, %c90], %12 {strides = array<i32>} : memref<112x945xf32, #tpu.memory_space<vmem>>, vector<14x45xf32>,
    %c0_11 = arith.constant 0 : index
    %c142 = arith.constant 142 : index
    %14 = vector.load %arg2[%c0_11, %c142] : memref<14x705xf32, #tpu.memory_space<vmem>>, vector<14x45xf32>
    %cst_12 = arith.constant 0.000000e+00 : f32
    %15 = vector.broadcast %cst_12 : f32 to vector<14x45xf32>
    %16 = arith.maximumf %14, %15 : vector<14x45xf32>
    %c0_13 = arith.constant 0 : index
    %c135 = arith.constant 135 : index
    %17 = vector.load %arg4[%c0_13, %c135] : memref<112x945xf32, #tpu.memory_space<vmem>>, vector<14x45xf32>
    tpu.vector_store %arg4[%c0_13, %c135], %16 {strides = array<i32>} : memref<112x945xf32, #tpu.memory_space<vmem>>, vector<14x45xf32>,
    %c0_14 = arith.constant 0 : index
    %c189 = arith.constant 189 : index
    %18 = vector.load %arg2[%c0_14, %c189] : memref<14x705xf32, #tpu.memory_space<vmem>>, vector<14x45xf32>
    %cst_15 = arith.constant 0.000000e+00 : f32
    %19 = vector.broadcast %cst_15 : f32 to vector<14x45xf32>
    %20 = arith.maximumf %18, %19 : vector<14x45xf32>
    %c0_16 = arith.constant 0 : index
    %c180 = arith.constant 180 : index
    %21 = vector.load %arg4[%c0_16, %c180] : memref<112x945xf32, #tpu.memory_space<vmem>>, vector<14x45xf32>
    tpu.vector_store %arg4[%c0_16, %c180], %20 {strides = array<i32>} : memref<112x945xf32, #tpu.memory_space<vmem>>, vector<14x45xf32>,
    %c0_17 = arith.constant 0 : index
    %c236 = arith.constant 236 : index
    %22 = vector.load %arg2[%c0_17, %c236] : memref<14x705xf32, #tpu.memory_space<vmem>>, vector<14x45xf32>
    %cst_18 = arith.constant 0.000000e+00 : f32
    %23 = vector.broadcast %cst_18 : f32 to vector<14x45xf32>
    %24 = arith.maximumf %22, %23 : vector<14x45xf32>
    %c0_19 = arith.constant 0 : index
    %c225 = arith.constant 225 : index
    %25 = vector.load %arg4[%c0_19, %c225] : memref<112x945xf32, #tpu.memory_space<vmem>>, vector<14x45xf32>
    tpu.vector_store %arg4[%c0_19, %c225], %24 {strides = array<i32>} : memref<112x945xf32, #tpu.memory_space<vmem>>, vector<14x45xf32>,
    %c0_20 = arith.constant 0 : index
    %c283 = arith.constant 283 : index
    %26 = vector.load %arg2[%c0_20, %c283] : memref<14x705xf32, #tpu.memory_space<vmem>>, vector<14x45xf32>
    %cst_21 = arith.constant 0.000000e+00 : f32
    %27 = vector.broadcast %cst_21 : f32 to vector<14x45xf32>
    %28 = arith.maximumf %26, %27 : vector<14x45xf32>
    %c0_22 = arith.constant 0 : index
    %c270 = arith.constant 270 : index
    %29 = vector.load %arg4[%c0_22, %c270] : memref<112x945xf32, #tpu.memory_space<vmem>>, vector<14x45xf32>
    tpu.vector_store %arg4[%c0_22, %c270], %28 {strides = array<i32>} : memref<112x945xf32, #tpu.memory_space<vmem>>, vector<14x45xf32>,
    %c0_23 = arith.constant 0 : index
    %c330 = arith.constant 330 : index
    %30 = vector.load %arg2[%c0_23, %c330] : memref<14x705xf32, #tpu.memory_space<vmem>>, vector<14x45xf32>
    %cst_24 = arith.constant 0.000000e+00 : f32
    %31 = vector.broadcast %cst_24 : f32 to vector<14x45xf32>
    %32 = arith.maximumf %30, %31 : vector<14x45xf32>
    %c0_25 = arith.constant 0 : index
    %c315 = arith.constant 315 : index
    %33 = vector.load %arg4[%c0_25, %c315] : memref<112x945xf32, #tpu.memory_space<vmem>>, vector<14x45xf32>
    tpu.vector_store %arg4[%c0_25, %c315], %32 {strides = array<i32>} : memref<112x945xf32, #tpu.memory_space<vmem>>, vector<14x45xf32>,
    %c0_26 = arith.constant 0 : index
    %c377 = arith.constant 377 : index
    %34 = vector.load %arg2[%c0_26, %c377] : memref<14x705xf32, #tpu.memory_space<vmem>>, vector<14x45xf32>
    %cst_27 = arith.constant 0.000000e+00 : f32
    %35 = vector.broadcast %cst_27 : f32 to vector<14x45xf32>
    %36 = arith.maximumf %34, %35 : vector<14x45xf32>
    %c0_28 = arith.constant 0 : index
    %c360 = arith.constant 360 : index
    %37 = vector.load %arg4[%c0_28, %c360] : memref<112x945xf32, #tpu.memory_space<vmem>>, vector<14x45xf32>
    tpu.vector_store %arg4[%c0_28, %c360], %36 {strides = array<i32>} : memref<112x945xf32, #tpu.memory_space<vmem>>, vector<14x45xf32>,
    %c0_29 = arith.constant 0 : index
    %c424 = arith.constant 424 : index
    %38 = vector.load %arg2[%c0_29, %c424] : memref<14x705xf32, #tpu.memory_space<vmem>>, vector<14x45xf32>
    %cst_30 = arith.constant 0.000000e+00 : f32
    %39 = vector.broadcast %cst_30 : f32 to vector<14x45xf32>
    %40 = arith.maximumf %38, %39 : vector<14x45xf32>
    %c0_31 = arith.constant 0 : index
    %c405 = arith.constant 405 : index
    %41 = vector.load %arg4[%c0_31, %c405] : memref<112x945xf32, #tpu.memory_space<vmem>>, vector<14x45xf32>
    tpu.vector_store %arg4[%c0_31, %c405], %40 {strides = array<i32>} : memref<112x945xf32, #tpu.memory_space<vmem>>, vector<14x45xf32>,
    %c0_32 = arith.constant 0 : index
    %c471 = arith.constant 471 : index
    %42 = vector.load %arg2[%c0_32, %c471] : memref<14x705xf32, #tpu.memory_space<vmem>>, vector<14x45xf32>
    %cst_33 = arith.constant 0.000000e+00 : f32
    %43 = vector.broadcast %cst_33 : f32 to vector<14x45xf32>
    %44 = arith.maximumf %42, %43 : vector<14x45xf32>
    %c0_34 = arith.constant 0 : index
    %c450 = arith.constant 450 : index
    %45 = vector.load %arg4[%c0_34, %c450] : memref<112x945xf32, #tpu.memory_space<vmem>>, vector<14x45xf32>
    tpu.vector_store %arg4[%c0_34, %c450], %44 {strides = array<i32>} : memref<112x945xf32, #tpu.memory_space<vmem>>, vector<14x45xf32>,
    %c0_35 = arith.constant 0 : index
    %c518 = arith.constant 518 : index
    %46 = vector.load %arg2[%c0_35, %c518] : memref<14x705xf32, #tpu.memory_space<vmem>>, vector<14x45xf32>
    %cst_36 = arith.constant 0.000000e+00 : f32
    %47 = vector.broadcast %cst_36 : f32 to vector<14x45xf32>
    %48 = arith.maximumf %46, %47 : vector<14x45xf32>
    %c0_37 = arith.constant 0 : index
    %c495 = arith.constant 495 : index
    %49 = vector.load %arg4[%c0_37, %c495] : memref<112x945xf32, #tpu.memory_space<vmem>>, vector<14x45xf32>
    tpu.vector_store %arg4[%c0_37, %c495], %48 {strides = array<i32>} : memref<112x945xf32, #tpu.memory_space<vmem>>, vector<14x45xf32>,
    %c0_38 = arith.constant 0 : index
    %c565 = arith.constant 565 : index
    %50 = vector.load %arg2[%c0_38, %c565] : memref<14x705xf32, #tpu.memory_space<vmem>>, vector<14x45xf32>
    %cst_39 = arith.constant 0.000000e+00 : f32
    %51 = vector.broadcast %cst_39 : f32 to vector<14x45xf32>
    %52 = arith.maximumf %50, %51 : vector<14x45xf32>
    %c0_40 = arith.constant 0 : index
    %c540 = arith.constant 540 : index
    %53 = vector.load %arg4[%c0_40, %c540] : memref<112x945xf32, #tpu.memory_space<vmem>>, vector<14x45xf32>
    tpu.vector_store %arg4[%c0_40, %c540], %52 {strides = array<i32>} : memref<112x945xf32, #tpu.memory_space<vmem>>, vector<14x45xf32>,
    %c0_41 = arith.constant 0 : index
    %c612 = arith.constant 612 : index
    %54 = vector.load %arg2[%c0_41, %c612] : memref<14x705xf32, #tpu.memory_space<vmem>>, vector<14x45xf32>
    %cst_42 = arith.constant 0.000000e+00 : f32
    %55 = vector.broadcast %cst_42 : f32 to vector<14x45xf32>
    %56 = arith.maximumf %54, %55 : vector<14x45xf32>
    %c0_43 = arith.constant 0 : index
    %c585 = arith.constant 585 : index
    %57 = vector.load %arg4[%c0_43, %c585] : memref<112x945xf32, #tpu.memory_space<vmem>>, vector<14x45xf32>
    tpu.vector_store %arg4[%c0_43, %c585], %56 {strides = array<i32>} : memref<112x945xf32, #tpu.memory_space<vmem>>, vector<14x45xf32>,
    %c0_44 = arith.constant 0 : index
    %c659 = arith.constant 659 : index
    %58 = vector.load %arg2[%c0_44, %c659] : memref<14x705xf32, #tpu.memory_space<vmem>>, vector<14x45xf32>
    %cst_45 = arith.constant 0.000000e+00 : f32
    %59 = vector.broadcast %cst_45 : f32 to vector<14x45xf32>
    %60 = arith.maximumf %58, %59 : vector<14x45xf32>
    %c0_46 = arith.constant 0 : index
    %c630 = arith.constant 630 : index
    %61 = vector.load %arg4[%c0_46, %c630] : memref<112x945xf32, #tpu.memory_space<vmem>>, vector<14x45xf32>
    tpu.vector_store %arg4[%c0_46, %c630], %60 {strides = array<i32>} : memref<112x945xf32, #tpu.memory_space<vmem>>, vector<14x45xf32>,
    %c0_47 = arith.constant 0 : index
    %c0_48 = arith.constant 0 : index
    %62 = vector.load %arg4[%c0_47, %c0_48] : memref<112x945xf32, #tpu.memory_space<vmem>>, vector<16x675xf32>
    %c16 = arith.constant 16 : index
    %c45_49 = arith.constant 45 : index
    %63 = vector.load %arg4[%c16, %c45_49] : memref<112x945xf32, #tpu.memory_space<vmem>>, vector<16x675xf32>
    tpu.vector_store %arg4[%c16, %c45_49], %62 {strides = array<i32>} : memref<112x945xf32, #tpu.memory_space<vmem>>, vector<16x675xf32>,
    %c32 = arith.constant 32 : index
    %c90_50 = arith.constant 90 : index
    %64 = vector.load %arg4[%c32, %c90_50] : memref<112x945xf32, #tpu.memory_space<vmem>>, vector<16x675xf32>
    tpu.vector_store %arg4[%c32, %c90_50], %62 {strides = array<i32>} : memref<112x945xf32, #tpu.memory_space<vmem>>, vector<16x675xf32>,
    %c48_51 = arith.constant 48 : index
    %c135_52 = arith.constant 135 : index
    %65 = vector.load %arg4[%c48_51, %c135_52] : memref<112x945xf32, #tpu.memory_space<vmem>>, vector<16x675xf32>
    tpu.vector_store %arg4[%c48_51, %c135_52], %62 {strides = array<i32>} : memref<112x945xf32, #tpu.memory_space<vmem>>, vector<16x675xf32>,
    %c64 = arith.constant 64 : index
    %c180_53 = arith.constant 180 : index
    %66 = vector.load %arg4[%c64, %c180_53] : memref<112x945xf32, #tpu.memory_space<vmem>>, vector<16x675xf32>
    tpu.vector_store %arg4[%c64, %c180_53], %62 {strides = array<i32>} : memref<112x945xf32, #tpu.memory_space<vmem>>, vector<16x675xf32>,
    %c80 = arith.constant 80 : index
    %c225_54 = arith.constant 225 : index
    %67 = vector.load %arg4[%c80, %c225_54] : memref<112x945xf32, #tpu.memory_space<vmem>>, vector<16x675xf32>
    tpu.vector_store %arg4[%c80, %c225_54], %62 {strides = array<i32>} : memref<112x945xf32, #tpu.memory_space<vmem>>, vector<16x675xf32>,
    %c96 = arith.constant 96 : index
    %c270_55 = arith.constant 270 : index
    %68 = vector.load %arg4[%c96, %c270_55] : memref<112x945xf32, #tpu.memory_space<vmem>>, vector<16x675xf32>
    tpu.vector_store %arg4[%c96, %c270_55], %62 {strides = array<i32>} : memref<112x945xf32, #tpu.memory_space<vmem>>, vector<16x675xf32>,
    %cst_56 = arith.constant 1.000000e+00 : f32
    %69 = vector.broadcast %cst_56 : f32 to vector<1x945xf32>
    %c15 = arith.constant 15 : index
    %c0_57 = arith.constant 0 : index
    %70 = vector.load %arg4[%c15, %c0_57] : memref<112x945xf32, #tpu.memory_space<vmem>>, vector<1x945xf32>
    tpu.vector_store %arg4[%c15, %c0_57], %69 {strides = array<i32>} : memref<112x945xf32, #tpu.memory_space<vmem>>, vector<1x945xf32>,
    %c0_58 = arith.constant 0 : index
    %c0_59 = arith.constant 0 : index
    %71 = vector.load %arg1[%c0_58, %c0_59] : memref<25x112xf32, #tpu.memory_space<vmem>>, vector<25x112xf32>
    %c0_60 = arith.constant 0 : index
    %c0_61 = arith.constant 0 : index
    %72 = vector.load %arg4[%c0_60, %c0_61] : memref<112x945xf32, #tpu.memory_space<vmem>>, vector<112x945xf32>
    %cst_62 = arith.constant dense<0.000000e+00> : vector<25x945xf32>
    %73 = tpu.matmul %71, %72, %cst_62 {dimension_numbers = #tpu.dot_dimension_numbers<[1], [0], [0], [1], [0, 0, 1, 1], [], []>} : vector<25x112xf32>, vector<112x945xf32>, vector<25x945xf32> -> vector<25x945xf32>
    %74 = arith.negf %73 : vector<25x945xf32>
    %75 = math.exp %74 : vector<25x945xf32>
    %cst_63 = arith.constant 1.000000e+00 : f32
    %76 = vector.broadcast %cst_63 : f32 to vector<25x945xf32>
    %77 = arith.addf %76, %75 : vector<25x945xf32>
    %78 = arith.divf %76, %77 : vector<25x945xf32>
    %79 = arith.mulf %73, %78 : vector<25x945xf32>
    %c0_64 = arith.constant 0 : index
    %c0_65 = arith.constant 0 : index
    %80 = vector.load %arg3[%c0_64, %c0_65] : memref<25x945xf32, #tpu.memory_space<vmem>>, vector<25x945xf32>
    tpu.vector_store %arg3[%c0_64, %c0_65], %79 {strides = array<i32>} : memref<25x945xf32, #tpu.memory_space<vmem>>, vector<25x945xf32>,
    return
  }
  func.func @transform_0(%arg0: i32) -> (i32, i32) {
    %c0_i32 = arith.constant 0 : i32
    %c0_i32_0 = arith.constant 0 : i32
    %c0_i32_1 = arith.constant 0 : i32
    return %c0_i32, %c0_i32_0 : i32, i32
  }
  func.func @transform_1(%arg0: i32) -> (i32, i32) {
    %c0_i32 = arith.constant 0 : i32
    %c0_i32_0 = arith.constant 0 : i32
    %c0_i32_1 = arith.constant 0 : i32
    return %c0_i32, %c0_i32_0 : i32, i32
  }
  func.func @transform_2(%arg0: i32) -> (i32, i32) {
    %c0_i32 = arith.constant 0 : i32
    %c0_i32_0 = arith.constant 0 : i32
    %c0_i32_1 = arith.constant 0 : i32
    return %c0_i32, %c0_i32_0 : i32, i32
  }
}

</mosaic_0001>

<bundles_post_ra>
// kernel: model_forward.1
= control target key start
LH: loop header
LB: loop body
LE: loop exit
PB: predicated region body
PF: predicated region fallthrough
CT: control target
= control target key end

     0   :  { %v1908_v3 = vmov 0.0   ;;  %s1909_s17 = smov 117   ;;  %s1910_s18 = smov 123   ;;  %vm252_vm0 = vcmask 113664   ;;  %vm185_vm1 = vcmask 56320   ;;  %vm18_vm2 = vcmask 400384   ;;  %s2772_s1 = inlined_call_operand.vmem [shape: f32[14,705], index: 1, kind: input, shape index: {}]   ;;  %s2773_s0 = inlined_call_operand.vmem [shape: f32[25,112], index: 0, kind: input, shape index: {}]   ;;  %s2774_s2 = inlined_call_operand.vmem [shape: f32[25,945], index: 2, kind: output, shape index: {}]  }
   0x1   :  { %v224_v0 = vld [vmem:[%s2772_s1 + $0x10] sm:$0xff]  ;;  %v157_v1 = vld [vmem:[%s2772_s1 + $0x8] sm:$0xff]  ;;  %v226_v2 = vld [vmem:[%s2772_s1 + $0x40] sm:$0x3f]  ;;  %13 = vst [vmem:[#allocation2 + $0x10] sm:$0xff] %v1908_v3  ;;  %1043 = vmatprep.mubr.f32.mxu0 %v1908_v3  ;;  %1132 = vmatprep.mubr.f32.mxu1 %v1908_v3  ;;  %s1911_s27 = smov 111  }
   0x2   :  { %11 = vst [vmem:[#allocation2] sm:$0xff] %v1908_v3  ;;  %12 = vst [vmem:[#allocation2 + $0x8] sm:$0xff] %v1908_v3  ;;  %v1992_v4 = vmax.f32 %v224_v0, 0.0  ;;  %v1994_v5 = vmax.f32 %v157_v1, 0.0  ;;  %v159_v6 = vld [vmem:[%s2772_s1 + $0x38] sm:$0x3f] }
   0x3   :  { %14 = vst [vmem:[#allocation2 + $0x18] sm:$0xff] %v1908_v3  ;;  %15 = vst [vmem:[#allocation2 + $0x20] sm:$0xff] %v1908_v3  ;;  %v230_v7 = vmax.f32 %v226_v2, 0.0  ;;  %v163_v8 = vmax.f32 %v159_v6, 0.0  ;;  %v293_v9 = vld [vmem:[%s2772_s1 + $0x48] sm:$0x3f] }
   0x4   :  { %16 = vst [vmem:[#allocation2 + $0x28] sm:$0xff] %v1908_v3  ;;  %17 = vst [vmem:[#allocation2 + $0x30] sm:$0xff] %v1908_v3  ;;  %237 = vrot.lane.b32.xlu1 %v1992_v4, %s1909_s17  ;;  %170 = vrot.lane.b32.xlu0 %v1994_v5, %s1910_s18  ;;  %v291_v10 = vld [vmem:[%s2772_s1 + $0x18] sm:$0xff]  ;;  %v297_v11 = vmax.f32 %v293_v9, 0.0  ;;  %v125_v13 = vld [vmem:[%s2772_s1 + $0x30] sm:$0x3f] }
   0x5   :  { %20 = vst [vmem:[#allocation2 + $0x40] sm:$0xff] %v1908_v3  ;;  %21 = vst [vmem:[#allocation2 + $0x48] sm:$0xff] %v1908_v3  ;;  %v295_v12 = vmax.f32 %v291_v10, 0.0  ;;  %v124_v14 = vld [vmem:[%s2772_s1] sm:$0xff]  ;;  %v127_v15 = vmax.f32 %v125_v13, 0.0  ;;  %s1912_s30 = smov 127  }
   0x6   :  { %22 = vst [vmem:[#allocation2 + $0x50] sm:$0xff] %v1908_v3  ;;  %23 = vst [vmem:[#allocation2 + $0x58] sm:$0xff] %v1908_v3  ;;  %v126_v16 = vmax.f32 %v124_v14, 0.0  ;;  %v192_v17 = vld [vmem:[%s2772_s1 + $0x38] sm:$0x3f]  ;;  %s1913_s5 = smov 121  }
   0x7   :  { %24 = vst [vmem:[#allocation2 + $0x60] sm:$0xff] %v1908_v3  ;;  %25 = vst [vmem:[#allocation2 + $0x68] sm:$0xff] %v1908_v3  ;;  %v194_v18 = vmax.f32 %v192_v17, 0.0  ;;  %v259_v19 = vld [vmem:[%s2772_s1 + $0x40] sm:$0x3f]  ;;  %s1914_s8 = smov 115  }
   0x8   :  { %26 = vst [vmem:[#allocation2 + $0x70] sm:$0xff] %v1908_v3  ;;  %28 = vst [vmem:[#allocation2 + $0x80] sm:$0xff] %v1908_v3  ;;  %241 = vrot.lane.b32.xlu1 %v230_v7, %s1909_s17  ;;  %174 = vrot.lane.b32.xlu0 %v163_v8, %s1910_s18  ;;  %v261_v20 = vmax.f32 %v259_v19, 0.0  ;;  %v326_v21 = vld [vmem:[%s2772_s1 + $0x48] sm:$0x3f]  ;;  %v342_v23 = vld [vmem:[%s2772_s1 + $0x20] sm:$0xff] }
   0x9   :  { %33 = vst [vmem:[#allocation2 + $0xa8] sm:$0xff] %v1908_v3  ;;  %36 = vst [vmem:[#allocation2 + $0xc0] sm:$0xff] %v1908_v3  ;;  %v328_v22 = vmax.f32 %v326_v21, 0.0  ;;  %s1915_s11 = smov 109   ;;  %v346_v24 = vmax.f32 %v342_v23, 0.0  ;;  %s1916_s16 = smov 107  }
   0xa   :  { %41 = vst [vmem:[#allocation2 + $0xe8] sm:$0xff] %v1908_v3  ;;  %44 = vst [vmem:[#allocation2 + $0x100] sm:$0xff] %v1908_v3  ;;  %v344_v25 = vld [vmem:[%s2772_s1 + $0x50] sm:$0x3f]  ;;  %v343_v26 = vld [vmem:[%s2772_s1 + $0x48] sm:$0x3f] }
   0xb   :  { %49 = vst [vmem:[#allocation2 + $0x128] sm:$0xff] %v1908_v3  ;;  %52 = vst [vmem:[#allocation2 + $0x140] sm:$0xff] %v1908_v3  ;;  %v348_v27 = vmax.f32 %v344_v25, 0.0  ;;  %v347_v28 = vmax.f32 %v343_v26, 0.0  ;;  %v141_v29 = vld [vmem:[%s2772_s1 + $0x30] sm:$0x3f] }
   0xc   :  { %57 = vst [vmem:[#allocation2 + $0x168] sm:$0xff] %v1908_v3  ;;  %61 = vst [vmem:[#allocation2 + $0x188] sm:$0xff] %v1908_v3  ;;  %308 = vrot.lane.b32.xlu1 %v297_v11, %s1911_s27  ;;  %304 = vrot.lane.b32.xlu0 %v295_v12, %s1911_s27  ;;  %v143_v30 = vmax.f32 %v141_v29, 0.0  ;;  %v158_v31 = vld [vmem:[%s2772_s1 + $0x30] sm:$0x3f]  ;;  %s1917_s23 = smov 125  }
   0xd   :  { %66 = vst [vmem:[#allocation2 + $0x1b0] sm:$0xff] %v1908_v3  ;;  %69 = vst [vmem:[#allocation2 + $0x1c8] sm:$0xff] %v1908_v3  ;;  %v162_v32 = vmax.f32 %v158_v31, 0.0  ;;  %v208_v33 = vld [vmem:[%s2772_s1 + $0x38] sm:$0x3f]  ;;  %s1918_s29 = smov 119  }
   0xe   :  { %74 = vst [vmem:[#allocation2 + $0x1f0] sm:$0xff] %v1908_v3  ;;  %77 = vst [vmem:[#allocation2 + $0x208] sm:$0xff] %v1908_v3  ;;  %v210_v34 = vmax.f32 %v208_v33, 0.0  ;;  %v225_v35 = vld [vmem:[%s2772_s1 + $0x38] sm:$0x3f]  ;;  %s1920_s9 = smov 105  }
   0xf   :  { %82 = vst [vmem:[#allocation2 + $0x230] sm:$0xff] %v1908_v3  ;;  %85 = vst [vmem:[#allocation2 + $0x248] sm:$0xff] %v1908_v3  ;;  %v229_v36 = vmax.f32 %v225_v35, 0.0  ;;  %v275_v37 = vld [vmem:[%s2772_s1 + $0x40] sm:$0x3f]  ;;  %v407_v45 = vld [vmem:[%s2772_s1 + $0x28] sm:$0xff] }
  0x10   :  { %90 = vst [vmem:[#allocation2 + $0x270] sm:$0xff] %v1908_v3  ;;  %93 = vst [vmem:[#allocation2 + $0x288] sm:$0xff] %v1908_v3  ;;  %132 = vrot.lane.b32.xlu1 %v127_v15, %s1912_s30  ;;  %130 = vrot.lane.b32.xlu0 %v126_v16, %s1912_s30  ;;  %v277_v38 = vmax.f32 %v275_v37, 0.0  ;;  %v292_v39 = vld [vmem:[%s2772_s1 + $0x40] sm:$0x3f]  ;;  %s1921_s12 = smov 103  }
  0x11   :  { %101 = vst [vmem:[#allocation2 + $0x2c8] sm:$0xff] %v1908_v3  ;;  %110 = vst [vmem:[#allocation2 + $0x310] sm:$0xff] %v1908_v3  ;;  %v296_v40 = vmax.f32 %v292_v39, 0.0  ;;  %v371_v41 = vld [vmem:[%s2772_s1 + $0x50] sm:$0x3f]  ;;  %v411_v46 = vmax.f32 %v407_v45, 0.0 }
  0x12   :  { %118 = vst [vmem:[#allocation2 + $0x350] sm:$0xff] %v1908_v3  ;;  %v373_v42 = vmax.f32 %v371_v41, 0.0  ;;  %v391_v43 = vld [vmem:[%s2772_s1 + $0x50] sm:$0x3f]  ;;  %v409_v48 = vld [vmem:[%s2772_s1 + $0x58] sm:$0x3f] }
  0x13   :  { %v393_v44 = vmax.f32 %v391_v43, 0.0  ;;  %v408_v47 = vld [vmem:[%s2772_s1 + $0x50] sm:$0x3f]  ;;  %v413_v50 = vmax.f32 %v409_v48, 0.0  ;;  %v436_v51 = vld [vmem:[%s2772_s1 + $0x58] sm:$0x3f] }
  0x14   :  { %199 = vrot.lane.b32.xlu1 %v194_v18, %s1913_s5  ;;  %197 = vrot.lane.b32.xlu0 %v1994_v5, %s1913_s5  ;;  %s1919_s5 = smov 113   ;;  %v412_v49 = vmax.f32 %v408_v47, 0.0  ;;  %v438_v52 = vmax.f32 %v436_v51, 0.0  ;;  %s1923_s21 = smov 99   ;;  %27 = vst.msk [vmem:[#allocation2 + $0x78] sm:$0xff] %vm18_vm2, %v1908_v3  ;;  %19 = vst.msk [vmem:[#allocation2 + $0x38] sm:$0xff] %vm18_vm2, %v1908_v3 }
  0x15   :  { %35 = vst.msk [vmem:[#allocation2 + $0xb8] sm:$0xff] %vm18_vm2, %v1908_v3  ;;  %43 = vst.msk [vmem:[#allocation2 + $0xf8] sm:$0xff] %vm18_vm2, %v1908_v3  ;;  %vm256_vm3 = vcmask 111616   ;;  %vm189_vm4 = vcmask 54272   ;;  %vm323_vm5 = vcmask 168960   ;;  %vm319_vm6 = vcmask 171008  }
  0x16   :  { %51 = vst.msk [vmem:[#allocation2 + $0x138] sm:$0xff] %vm18_vm2, %v1908_v3  ;;  %59 = vst.msk [vmem:[#allocation2 + $0x178] sm:$0xff] %vm18_vm2, %v1908_v3  ;;  %vm138_vm7 = vcmask 365568   ;;  %vm136_vm8 = vcmask 367616   ;;  %vm205_vm9 = vcmask 422968   ;;  %vm203_vm10 = vcmask 425016  }
  0x17   :  { %67 = vst.msk [vmem:[#allocation2 + $0x1b8] sm:$0xff] %vm18_vm2, %v1908_v3  ;;  %75 = vst.msk [vmem:[#allocation2 + $0x1f8] sm:$0xff] %vm18_vm2, %v1908_v3  ;;  %vm272_vm11 = vcmask 480368   ;;  %vm270_vm12 = vcmask 482416   ;;  %vm339_vm13 = vcmask 537768   ;;  %vm337_vm14 = vcmask 539816  }
  0x18   :  { %266 = vrot.lane.b32.xlu1 %v261_v20, %s1914_s8  ;;  %264 = vrot.lane.b32.xlu0 %v1992_v4, %s1914_s8  ;;  %83 = vst.msk [vmem:[#allocation2 + $0x238] sm:$0xff] %vm18_vm2, %v1908_v3  ;;  %91 = vst.msk [vmem:[#allocation2 + $0x278] sm:$0xff] %vm18_vm2, %v1908_v3  ;;  %vm361_vm15 = vcmask 875520   ;;  %s1924_s1 = smov 7   ;;  %s1925_s22 = smov 45   ;;  %v1927_v43 = vmov 1.0  }
  0x19   :  { %99 = vst.msk [vmem:[#allocation2 + $0x2b8] sm:$0xff] %vm18_vm2, %v1908_v3  ;;  %107 = vst.msk [vmem:[#allocation2 + $0x2f8] sm:$0xff] %vm18_vm2, %v1908_v3  ;;  %s1928_s24 = smov 52   ;;  %s1929_s25 = smov 97  }
  0x1a   :  { %115 = vst.msk [vmem:[#allocation2 + $0x338] sm:$0xff] %vm18_vm2, %v1908_v3  ;;  %123 = vst.msk [vmem:[#allocation2 + $0x378] sm:$0xff] %vm18_vm2, %v1908_v3  ;;  %s1930_s26 = smov 14  }
  0x1c   :  { %333 = vrot.lane.b32.xlu1 %v328_v22, %s1915_s11  ;;  %331 = vrot.lane.b32.xlu0 %v295_v12, %s1915_s11 }
  0x20   :  { %355 = vrot.lane.b32.xlu1 %v346_v24, %s1916_s16  ;;  %353 = vrot.lane.b32.xlu0 %v295_v12, %s1916_s16 }
  0x24   :  { %359 = vrot.lane.b32.xlu1 %v348_v27, %s1916_s16  ;;  %357 = vrot.lane.b32.xlu0 %v347_v28, %s1916_s16  ;;  %s1922_s16 = smov 101  }
  0x28   :  { %148 = vrot.lane.b32.xlu1 %v143_v30, %s1917_s23  ;;  %146 = vrot.lane.b32.xlu0 %v126_v16, %s1917_s23  ;;  %s1926_s23 = smov 90  }
  0x2c   :  { %172 = vrot.lane.b32.xlu1 %v162_v32, %s1910_s18  ;;  %168 = vrot.lane.b32.xlu0 %v126_v16, %s1910_s18  ;;  %v843_v32 = vlaneseq }
  0x30   :  { %215 = vrot.lane.b32.xlu1 %v210_v34, %s1918_s29  ;;  %213 = vrot.lane.b32.xlu0 %v1994_v5, %s1918_s29 }
  0x34   :  { %239 = vrot.lane.b32.xlu1 %v229_v36, %s1909_s17  ;;  %235 = vrot.lane.b32.xlu0 %v1994_v5, %s1909_s17 }
  0x38   :  { %282 = vrot.lane.b32.xlu1 %v277_v38, %s1919_s5  ;;  %280 = vrot.lane.b32.xlu0 %v1992_v4, %s1919_s5 }
  0x3c   :  { %306 = vrot.lane.b32.xlu1 %v296_v40, %s1911_s27  ;;  %302 = vrot.lane.b32.xlu0 %v1992_v4, %s1911_s27 }
  0x40   :  { %378 = vrot.lane.b32.xlu1 %v373_v42, %s1920_s9  ;;  %376 = vrot.lane.b32.xlu0 %v346_v24, %s1920_s9 }
  0x44   :  { %396 = vrot.lane.b32.xlu0 %v346_v24, %s1921_s12  ;;  %398 = vrot.lane.b32.xlu1 %v393_v44, %s1921_s12 }
  0x48   :  { %418 = vrot.lane.b32.xlu0 %v346_v24, %s1922_s16  ;;  %420 = vrot.lane.b32.xlu1 %v411_v46, %s1922_s16 }
  0x4c   :  { %422 = vrot.lane.b32.xlu0 %v412_v49, %s1922_s16  ;;  %424 = vrot.lane.b32.xlu1 %v413_v50, %s1922_s16 }
  0x50   :  { %441 = vrot.lane.b32.xlu0 %v411_v46, %s1923_s21  ;;  %443 = vrot.lane.b32.xlu1 %v438_v52, %s1923_s21 }
  0x76   :  { %v2085_v53 = vpop.permute.xlu1 %237  ;;  %v2087_v54 = vpop.permute.xlu0 %170 }
  0x77   :  { %253 = vst.msk [vmem:[#allocation2 + $0x10] sm:$0xff] %vm252_vm0, %v2085_v53 }
  0x78   :  { %186 = vst.msk [vmem:[#allocation2 + $0x8] sm:$0xff] %vm185_vm1, %v2087_v54 }
  0x7a   :  { %v2121_v55 = vpop.permute.xlu1 %241  ;;  %v175_v56 = vpop.permute.xlu0 %174 }
  0x7b   :  { %257 = vst.msk [vmem:[#allocation2 + $0x50] sm:$0x3f] %vm256_vm3, %v2121_v55  ;;  %vm366_vm3 = vcmask 908816  }
  0x7c   :  { %190 = vst.msk [vmem:[#allocation2 + $0x48] sm:$0x3f] %vm189_vm4, %v175_v56  ;;  %vm368_vm4 = vcmask 906768  }
  0x7e   :  { %v2124_v57 = vpop.permute.xlu1 %308  ;;  %v2126_v58 = vpop.permute.xlu0 %304 }
  0x7f   :  { %324 = vst.msk [vmem:[#allocation2 + $0x58] sm:$0x3f] %vm323_vm5, %v2124_v57  ;;  %vm154_vm5 = vcmask 734568  }
  0x80   :  { %320 = vst.msk [vmem:[#allocation2 + $0x18] sm:$0xff] %vm319_vm6, %v2126_v58  ;;  %vm152_vm6 = vcmask 736616  }
  0x82   :  { %v133_v59 = vpop.permute.xlu1 %132  ;;  %v131_v60 = vpop.permute.xlu0 %130 }
  0x83   :  { %139 = vst.msk [vmem:[#allocation2 + $0x40] sm:$0x3f] %vm138_vm7, %v133_v59  ;;  %vm176_vm7 = vcmask 1006592  }
  0x84   :  { %137 = vst.msk [vmem:[#allocation2] sm:$0xff] %vm136_vm8, %v131_v60 }
  0x86   :  { %v200_v61 = vpop.permute.xlu1 %199  ;;  %v198_v62 = vpop.permute.xlu0 %197 }
  0x87   :  { %206 = vst.msk [vmem:[#allocation2 + $0x48] sm:$0x3f] %vm205_vm9, %v200_v61  ;;  %vm187_vm9 = vcmask 1046224  }
  0x88   :  { %204 = vst.msk [vmem:[#allocation2 + $0x8] sm:$0xff] %vm203_vm10, %v198_v62  ;;  %vm183_vm10 = vcmask 1048272  }
  0x8a   :  { %v267_v63 = vpop.permute.xlu1 %266  ;;  %v265_v0 = vpop.permute.xlu0 %264 }
  0x8b   :  { %273 = vst.msk [vmem:[#allocation2 + $0x50] sm:$0x3f] %vm272_vm11, %v267_v63  ;;  %vm221_vm11 = vcmask 791968  }
  0x8c   :  { %271 = vst.msk [vmem:[#allocation2 + $0x10] sm:$0xff] %vm270_vm12, %v265_v0  ;;  %vm219_vm12 = vcmask 794016  }
  0x8e   :  { %v334_v1 = vpop.permute.xlu1 %333  ;;  %v332_v2 = vpop.permute.xlu0 %331 }
  0x8f   :  { %340 = vst.msk [vmem:[#allocation2 + $0x58] sm:$0x3f] %vm339_vm13, %v334_v1  ;;  %vm243_vm13 = vcmask 957440  }
  0x90   :  { %338 = vst.msk [vmem:[#allocation2 + $0x18] sm:$0xff] %vm337_vm14, %v332_v2  ;;  %vm254_vm14 = vcmask 1046280  }
  0x92   :  { %v356_v3 = vpop.permute.xlu1 %355  ;;  %v354_v4 = vpop.permute.xlu0 %353 }
  0x93   :  { %v362_v5 = vsel %vm361_vm15, %v354_v4, %v356_v3 }
  0x94   :  { %367 = vst.msk [vmem:[#allocation2 + $0x18] sm:$0xff] %vm366_vm3, %v362_v5  ;;  %vm288_vm3 = vcmask 849368  }
  0x96   :  { %v360_v6 = vpop.permute.xlu1 %359  ;;  %v358_v7 = vpop.permute.xlu0 %357 }
  0x97   :  { %v363_v8 = vsel %vm361_vm15, %v358_v7, %v360_v6  ;;  %vm250_vm15 = vcmask 1048328  }
  0x98   :  { %369 = vst.msk [vmem:[#allocation2 + $0x58] sm:$0x3f] %vm368_vm4, %v363_v8  ;;  %vm286_vm4 = vcmask 851416  }
  0x9a   :  { %v149_v9 = vpop.permute.xlu1 %148  ;;  %v147_v10 = vpop.permute.xlu0 %146 }
  0x9b   :  { %155 = vst.msk [vmem:[#allocation2 + $0x40] sm:$0x3f] %vm154_vm5, %v149_v9  ;;  %vm310_vm5 = vcmask 908288  }
  0x9c   :  { %153 = vst.msk [vmem:[#allocation2] sm:$0xff] %vm152_vm6, %v147_v10  ;;  %vm321_vm6 = vcmask 1046336  }
  0x9e   :  { %v173_v11 = vpop.permute.xlu1 %172  ;;  %v169_v12 = vpop.permute.xlu0 %168 }
  0x9f   :  { %v178_v13 = vsel %vm176_vm7, %v173_v11, %v175_v56  ;;  %v177_v14 = vsel %vm176_vm7, %v169_v12, %v2087_v54  ;;  %vm317_vm7 = vcmask 1048384  }
  0xa0   :  { %188 = vst.msk [vmem:[#allocation2 + $0x40] sm:$0x3f] %vm187_vm9, %v178_v13  ;;  %vm386_vm9 = vcmask 1046392  }
  0xa1   :  { %184 = vst.msk [vmem:[#allocation2] sm:$0xff] %vm183_vm10, %v177_v14 }
  0xa2   :  { %v216_v15 = vpop.permute.xlu1 %215  ;;  %v214_v16 = vpop.permute.xlu0 %213 }
  0xa3   :  { %222 = vst.msk [vmem:[#allocation2 + $0x48] sm:$0x3f] %vm221_vm11, %v216_v15  ;;  %vm388_vm11 = vcmask 226304  }
  0xa4   :  { %220 = vst.msk [vmem:[#allocation2 + $0x8] sm:$0xff] %vm219_vm12, %v214_v16  ;;  %vm382_vm12 = vcmask 1048440  }
  0xa6   :  { %v240_v17 = vpop.permute.xlu1 %239  ;;  %v236_v18 = vpop.permute.xlu0 %235 }
  0xa7   :  { %v245_v19 = vsel %vm243_vm13, %v240_v17, %v2121_v55  ;;  %v244_v20 = vsel %vm243_vm13, %v236_v18, %v2085_v53  ;;  %v2135_v21 = vld [vmem:[#allocation2 + $0x40] sm:$0xff]  ;;  %vm384_vm13 = vcmask 228352  }
  0xa8   :  { %v2137_v22 = vld [vmem:[#allocation2] sm:$0xff]  ;;  %255 = vst.msk [vmem:[#allocation2 + $0x48] sm:$0x3f] %vm254_vm14, %v245_v19  ;;  %611 = vrot.lane.b32.xlu1 %v2135_v21, %s1924_s1  ;;  %vm402_vm14 = vcmask 597216  }
  0xa9   :  { %251 = vst.msk [vmem:[#allocation2 + $0x8] sm:$0xff] %vm250_vm15, %v244_v20  ;;  %479 = vrot.lane.b32.xlu0 %v2137_v22, %s1925_s22 }
  0xaa   :  { %v283_v23 = vpop.permute.xlu1 %282  ;;  %v281_v24 = vpop.permute.xlu0 %280 }
  0xab   :  { %289 = vst.msk [vmem:[#allocation2 + $0x50] sm:$0x3f] %vm288_vm3, %v283_v23  ;;  %vm404_vm3 = vcmask 595168  }
  0xac   :  { %287 = vst.msk [vmem:[#allocation2 + $0x10] sm:$0xff] %vm286_vm4, %v281_v24  ;;  %vm2158_vm4 = vcmp.lt.s32.totalorder %v843_v32, 945 }
  0xad   :  { %491 = vrot.lane.b32.xlu0 %v2135_v21, %s1925_s22 }
  0xae   :  { %v307_v25 = vpop.permute.xlu1 %306  ;;  %v303_v26 = vpop.permute.xlu0 %302 }
  0xaf   :  { %v312_v27 = vsel %vm310_vm5, %v307_v25, %v2124_v57  ;;  %v311_v28 = vsel %vm310_vm5, %v303_v26, %v2126_v58  ;;  %vm426_vm5 = vcmask 826368   ;;  %v2162_v36 = vld [vmem:[#allocation2 + $0x48] sm:$0xff] }
  0xb0   :  { %v2148_v29 = vld [vmem:[#allocation2 + $0x8] sm:$0xff]  ;;  %322 = vst.msk [vmem:[#allocation2 + $0x50] sm:$0x3f] %vm321_vm6, %v312_v27  ;;  %vm431_vm6 = vcmask 966216  }
  0xb1   :  { %318 = vst.msk [vmem:[#allocation2 + $0x10] sm:$0xff] %vm317_vm7, %v311_v28  ;;  %539 = vrot.lane.b32.xlu0 %v2137_v22, %s1926_s23  ;;  %481 = vrot.lane.b32.xlu1 %v2148_v29, %s1925_s22  ;;  %vm433_vm7 = vcmask 964168  }
  0xb2   :  { %v379_v30 = vpop.permute.xlu1 %378  ;;  %v377_v31 = vpop.permute.xlu0 %376 }
  0xb3   :  { %387 = vst.msk [vmem:[#allocation2 + $0x58] sm:$0x3f] %vm386_vm9, %v379_v30  ;;  %vm447_vm9 = vcmask 1048496  }
  0xb4   :  { %389 = vst.msk [vmem:[#allocation2 + $0x60] sm:$0x3f] %vm388_vm11, %v379_v30  ;;  %vm449_vm11 = vcmask 285696  }
  0xb5   :  { %383 = vst.msk [vmem:[#allocation2 + $0x18] sm:$0xff] %vm382_vm12, %v377_v31  ;;  %551 = vrot.lane.b32.xlu0 %v2135_v21, %s1926_s23  ;;  %vm451_vm12 = vcmask 1046448  }
  0xb6   :  { %385 = vst.msk [vmem:[#allocation2 + $0x20] sm:$0xff] %vm384_vm13, %v377_v31  ;;  %v397_v33 = vpop.permute.xlu0 %396  ;;  %v399_v34 = vpop.permute.xlu1 %398  ;;  %vm453_vm13 = vcmask 283648  }
  0xb7   :  { %403 = vst.msk [vmem:[#allocation2 + $0x20] sm:$0xff] %vm402_vm14, %v397_v33  ;;  %v2166_v38 = vld [vmem:[#allocation2 + $0x50] sm:$0xff]  ;;  %vm645_vm14 = vcmask 1047608  }
  0xb8   :  { %405 = vst.msk [vmem:[#allocation2 + $0x60] sm:$0x3f] %vm404_vm3, %v399_v34  ;;  %v2172_v42 = vld [vmem:[#allocation2 + $0x10] sm:$0xff]  ;;  %vm525_vm3 = vcmask 1047912  }
  0xb9   :  { %599 = vrot.lane.b32.xlu0 %v2137_v22, %s1924_s1 }
  0xba   :  { %v2168_v39 = vld [vmem:[#allocation2 + $0x58] sm:$0xff]  ;;  %v419_v40 = vpop.permute.xlu0 %418  ;;  %v421_v41 = vpop.permute.xlu1 %420 }
  0xbb   :  { %848 = vst.msk [vmem:[#allocation2 + $0x47] ss:$8 sm:$0xf] %vm2158_vm4, %v1927_v43  ;;  %v427_v44 = vsel %vm426_vm5, %v419_v40, %v421_v41 }
  0xbc   :  { %v2164_v37 = vld [vmem:[#allocation2 + $0x18] sm:$0xff]  ;;  %432 = vst.msk [vmem:[#allocation2 + $0x20] sm:$0xff] %vm431_vm6, %v427_v44  ;;  %vm744_vm6 = vcmask 793600  }
  0xbd   :  { %485 = vrot.lane.b32.xlu1 %v2164_v37, %s1925_s22  ;;  %483 = vrot.lane.b32.xlu0 %v2172_v42, %s1925_s22 }
  0xbe   :  { %v423_v45 = vpop.permute.xlu0 %422  ;;  %v425_v46 = vpop.permute.xlu1 %424 }
  0xbf   :  { %v428_v47 = vsel %vm426_vm5, %v423_v45, %v425_v46  ;;  %vm706_vm5 = vcmask 1047968  }
  0xc0   :  { %434 = vst.msk [vmem:[#allocation2 + $0x60] sm:$0x3f] %vm433_vm7, %v428_v47  ;;  %vm830_vm7 = vcmask 1047664  }
  0xc1   :  { %493 = vrot.lane.b32.xlu1 %v2162_v36, %s1925_s22  ;;  %495 = vrot.lane.b32.xlu0 %v2166_v38, %s1925_s22 }
  0xc2   :  { %v863_v48 = vld [vmem:[#allocation2 + $0x48] sm:$0xff]  ;;  %v865_v49 = vld [vmem:[#allocation2 + $0x58] sm:$0xff]  ;;  %v862_v50 = vld [vmem:[#allocation2 + $0x40] sm:$0xff]  ;;  %v442_v51 = vpop.permute.xlu0 %441  ;;  %v444_v52 = vpop.permute.xlu1 %443 }
  0xc3   :  { %v1644_v53 = vpack.c.bf16 %v863_v48, %v2148_v29  ;;  %v1672_v54 = vpack.c.bf16 %v865_v49, %v2164_v37  ;;  %v1646_v55 = vpack.c.bf16 %v862_v50, %v2137_v22  ;;  %v864_v56 = vld [vmem:[#allocation2 + $0x50] sm:$0xff]  ;;  %448 = vst.msk [vmem:[#allocation2 + $0x20] sm:$0xff] %vm447_vm9, %v442_v51  ;;  %vm966_vm9 = vcmask 916480  }
  0xc4   :  { %450 = vst.msk [vmem:[#allocation2 + $0x28] sm:$0xff] %vm449_vm11, %v442_v51  ;;  %v1674_v57 = vpack.c.bf16 %v864_v56, %v2172_v42  ;;  %v1931_v51 = vmov 0.0|0.0   ;;  %vm591_vm11 = vcmask 1022976  }
  0xc5   :  { %497 = vrot.lane.b32.xlu1 %v2168_v39, %s1925_s22  ;;  %452 = vst.msk [vmem:[#allocation2 + $0x60] sm:$0x3f] %vm451_vm12, %v444_v52  ;;  %543 = vrot.lane.b32.xlu0 %v2172_v42, %s1926_s23  ;;  %vm712_vm12 = vcmask 711680  }
  0xc6   :  { %454 = vst.msk [vmem:[#allocation2 + $0x68] sm:$0x3f] %vm453_vm13, %v444_v52  ;;  %1645 = vmatprep.subr.bf16.mxu0 %v1644_v53  ;;  %1673 = vmatprep.subr.bf16.mxu1 %v1672_v54 }
  0xc7   :  { %1647 = vmatpush1.bf16.msra.mxu0 %v1646_v55  ;;  %1675 = vmatpush1.bf16.msra.mxu1 %v1674_v57 }
  0xc9   :  { %541 = vrot.lane.b32.xlu1 %v2148_v29, %s1926_s23  ;;  %555 = vrot.lane.b32.xlu0 %v2166_v38, %s1926_s23 }
  0xca   :  { %v2242_v60 = vld [vmem:[#allocation2 + $0x20] sm:$0xff] }
  0xcb   :  { %v2256_v61 = vld [vmem:[#allocation2 + $0x28] sm:$0xff] }
  0xcc   :  { %v2196_v58 = vld [vmem:[#allocation2 + $0x60] sm:$0xff] }
  0xcd   :  { %545 = vrot.lane.b32.xlu1 %v2164_v37, %s1926_s23  ;;  %v2200_v59 = vld [vmem:[#allocation2 + $0x68] sm:$0xff]  ;;  %601 = vrot.lane.b32.xlu0 %v2148_v29, %s1924_s1 }
  0xce   :  { %849 = vst.msk [vmem:[#allocation2 + $0x47] ss:$8 sm:$0xf0] %vm2158_vm4, %v1927_v43  ;;  %vm683_vm4 = vcmask 424960  }
  0xd1   :  { %553 = vrot.lane.b32.xlu1 %v2162_v36, %s1926_s23  ;;  %613 = vrot.lane.b32.xlu0 %v2162_v36, %s1924_s1 }
  0xd5   :  { %557 = vrot.lane.b32.xlu1 %v2168_v39, %s1926_s23  ;;  %661 = vrot.lane.b32.xlu0 %v2148_v29, %s1928_s24 }
  0xd9   :  { %603 = vrot.lane.b32.xlu1 %v2172_v42, %s1924_s1  ;;  %673 = vrot.lane.b32.xlu0 %v2162_v36, %s1928_s24 }
  0xdd   :  { %615 = vrot.lane.b32.xlu1 %v2166_v38, %s1924_s1  ;;  %659 = vrot.lane.b32.xlu0 %v2137_v22, %s1928_s24 }
  0xe1   :  { %663 = vrot.lane.b32.xlu1 %v2172_v42, %s1928_s24  ;;  %722 = vrot.lane.b32.xlu0 %v2148_v29, %s1929_s25 }
  0xe5   :  { %675 = vrot.lane.b32.xlu1 %v2166_v38, %s1928_s24  ;;  %734 = vrot.lane.b32.xlu0 %v2162_v36, %s1929_s25 }
  0xe9   :  { %671 = vrot.lane.b32.xlu1 %v2135_v21, %s1928_s24  ;;  %720 = vrot.lane.b32.xlu0 %v2137_v22, %s1929_s25 }
  0xed   :  { %724 = vrot.lane.b32.xlu1 %v2172_v42, %s1929_s25  ;;  %784 = vrot.lane.b32.xlu0 %v2137_v22, %s1930_s26 }
  0xf1   :  { %736 = vrot.lane.b32.xlu1 %v2166_v38, %s1929_s25  ;;  %796 = vrot.lane.b32.xlu0 %v2135_v21, %s1930_s26 }
  0xf5   :  { %732 = vrot.lane.b32.xlu1 %v2135_v21, %s1929_s25  ;;  %487 = vrot.lane.b32.xlu0 %v2242_v60, %s1925_s22 }
  0xf9   :  { %786 = vrot.lane.b32.xlu1 %v2148_v29, %s1930_s26  ;;  %499 = vrot.lane.b32.xlu0 %v2196_v58, %s1925_s22 }
  0xfd   :  { %798 = vrot.lane.b32.xlu1 %v2162_v36, %s1930_s26  ;;  %547 = vrot.lane.b32.xlu0 %v2242_v60, %s1926_s23 }
 0x101   :  { %489 = vrot.lane.b32.xlu1 %v2256_v61, %s1925_s22  ;;  %559 = vrot.lane.b32.xlu0 %v2196_v58, %s1926_s23 }
 0x105   :  { %501 = vrot.lane.b32.xlu1 %v2200_v59, %s1925_s22  ;;  %605 = vrot.lane.b32.xlu0 %v2164_v37, %s1924_s1 }
 0x109   :  { %549 = vrot.lane.b32.xlu1 %v2256_v61, %s1926_s23  ;;  %617 = vrot.lane.b32.xlu0 %v2168_v39, %s1924_s1 }
 0x10d   :  { %561 = vrot.lane.b32.xlu1 %v2200_v59, %s1926_s23  ;;  %609 = vrot.lane.b32.xlu0 %v2256_v61, %s1924_s1 }
 0x111   :  { %607 = vrot.lane.b32.xlu1 %v2242_v60, %s1924_s1  ;;  %665 = vrot.lane.b32.xlu0 %v2164_v37, %s1928_s24 }
 0x115   :  { %619 = vrot.lane.b32.xlu1 %v2196_v58, %s1924_s1  ;;  %677 = vrot.lane.b32.xlu0 %v2168_v39, %s1928_s24 }
 0x119   :  { %621 = vrot.lane.b32.xlu1 %v2200_v59, %s1924_s1  ;;  %669 = vrot.lane.b32.xlu0 %v2256_v61, %s1928_s24 }
 0x11a   :  { %v2286_v62 = vpop.permute.xlu1 %611 }
 0x11b   :  { %v480_v63 = vpop.permute.xlu0 %479  ;;  %653 = vst.msk [vmem:[#allocation2 + $0x1c8] sm:$0xff] %vm645_vm14, %v2286_v62 }
 0x11c   :  { %526 = vst.msk [vmem:[#allocation2 + $0x80] sm:$0xff] %vm525_vm3, %v480_v63 }
 0x11d   :  { %667 = vrot.lane.b32.xlu1 %v2242_v60, %s1928_s24  ;;  %726 = vrot.lane.b32.xlu0 %v2164_v37, %s1929_s25 }
 0x11f   :  { %v492_v0 = vpop.permute.xlu0 %491 }
 0x120   :  { %533 = vst.msk [vmem:[#allocation2 + $0xc0] sm:$0xff] %vm525_vm3, %v492_v0 }
 0x121   :  { %679 = vrot.lane.b32.xlu1 %v2196_v58, %s1928_s24  ;;  %738 = vrot.lane.b32.xlu0 %v2168_v39, %s1929_s25 }
 0x122   :  { %v911_v41 = vld [vmem:[#allocation2 + $0x1c8] sm:$0xff] }
 0x123   :  { %v482_v1 = vpop.permute.xlu1 %481  ;;  %v540_v2 = vpop.permute.xlu0 %539  ;;  %v870_v16 = vld [vmem:[#allocation2 + $0x80] sm:$0xff] }
 0x124   :  { %v503_v3 = vsel %vm136_vm8, %v480_v63, %v482_v1  ;;  %586 = vst.msk [vmem:[#allocation2 + $0x100] sm:$0xff] %vm183_vm10, %v540_v2 }
 0x125   :  { %681 = vrot.lane.b32.xlu1 %v2200_v59, %s1928_s24  ;;  %730 = vrot.lane.b32.xlu0 %v2256_v61, %s1929_s25 }
 0x127   :  { %v552_v4 = vpop.permute.xlu0 %551  ;;  %v878_v11 = vld [vmem:[#allocation2 + $0xc0] sm:$0xff] }
 0x128   :  { %593 = vst.msk [vmem:[#allocation2 + $0x140] sm:$0xff] %vm183_vm10, %v552_v4  ;;  %v1650_v17 = vpack.c.bf16 %v878_v11, %v870_v16  ;;  %vm563_vm10 = vcmask 736256  }
 0x129   :  { %728 = vrot.lane.b32.xlu1 %v2242_v60, %s1929_s25  ;;  %788 = vrot.lane.b32.xlu0 %v2172_v42, %s1930_s26 }
 0x12b   :  { %v600_v5 = vpop.permute.xlu0 %599 }
 0x12c   :  { %646 = vst.msk [vmem:[#allocation2 + $0x188] sm:$0xff] %vm645_vm14, %v600_v5 }
 0x12d   :  { %740 = vrot.lane.b32.xlu1 %v2196_v58, %s1929_s25  ;;  %792 = vrot.lane.b32.xlu0 %v2242_v60, %s1930_s26 }
 0x12f   :  { %v2314_v6 = vpop.permute.xlu1 %485  ;;  %v484_v7 = vpop.permute.xlu0 %483  ;;  %v894_v32 = vld [vmem:[#allocation2 + $0x140] sm:$0xff] }
 0x130   :  { %v504_v8 = vsel %vm136_vm8, %v482_v1, %v484_v7  ;;  %v505_v9 = vsel %vm136_vm8, %v484_v7, %v2314_v6 }
 0x131   :  { %742 = vrot.lane.b32.xlu1 %v2200_v59, %s1929_s25  ;;  %800 = vrot.lane.b32.xlu0 %v2166_v38, %s1930_s26 }
 0x133   :  { %v494_v10 = vpop.permute.xlu1 %493  ;;  %v496_v13 = vpop.permute.xlu0 %495  ;;  %v903_v36 = vld [vmem:[#allocation2 + $0x188] sm:$0xff] }
 0x134   :  { %v508_v12 = vsel %vm136_vm8, %v492_v0, %v494_v10  ;;  %v509_v14 = vsel %vm136_vm8, %v494_v10, %v496_v13  ;;  %v1656_v43 = vpack.c.bf16 %v911_v41, %v903_v36  ;;  %v868_v41 = vld [vmem:[#allocation2 + $0x70] sm:$0xff] }
 0x135   :  { %790 = vrot.lane.b32.xlu1 %v2164_v37, %s1930_s26  ;;  %v1648_v15 = vpack.c.bf16 %v508_v12, %v503_v3  ;;  %804 = vrot.lane.b32.xlu0 %v2196_v58, %s1930_s26  ;;  %v1678_v22 = vpack.c.bf16 %v509_v14, %v504_v8 }
 0x137   :  { %v2329_v18 = vpop.permute.xlu1 %497  ;;  %1649 = vmatprep.subr.bf16.mxu0 %v1648_v15  ;;  %v544_v20 = vpop.permute.xlu0 %543 }
 0x138   :  { %v510_v19 = vsel %vm136_vm8, %v496_v13, %v2329_v18  ;;  %1651 = vmatpush1.bf16.msra.mxu0 %v1650_v17 }
 0x139   :  { %794 = vrot.lane.b32.xlu1 %v2256_v61, %s1930_s26  ;;  %v1676_v21 = vpack.c.bf16 %v510_v19, %v505_v9 }
 0x13b   :  { %v542_v23 = vpop.permute.xlu1 %541  ;;  %1677 = vmatprep.subr.bf16.mxu1 %v1676_v21  ;;  %v556_v26 = vpop.permute.xlu0 %555 }
 0x13c   :  { %v564_v24 = vsel %vm563_vm10, %v540_v2, %v542_v23  ;;  %v565_v25 = vsel %vm563_vm10, %v542_v23, %v544_v20  ;;  %1679 = vmatpush1.bf16.msra.mxu1 %v1678_v22 }
 0x13d   :  { %802 = vrot.lane.b32.xlu1 %v2168_v39, %s1930_s26  ;;  %v886_v39 = vld [vmem:[#allocation2 + $0x100] sm:$0xff] }
 0x13e   :  { %v1654_v40 = vpack.c.bf16 %v894_v32, %v886_v39 }
 0x13f   :  { %v2339_v27 = vpop.permute.xlu1 %545  ;;  %v602_v29 = vpop.permute.xlu0 %601 }
 0x140   :  { %v566_v28 = vsel %vm563_vm10, %v544_v20, %v2339_v27  ;;  %v623_v30 = vsel %vm185_vm1, %v600_v5, %v602_v29 }
 0x141   :  { %806 = vrot.lane.b32.xlu1 %v2200_v59, %s1930_s26 }
 0x143   :  { %v554_v31 = vpop.permute.xlu1 %553  ;;  %v614_v35 = vpop.permute.xlu0 %613 }
 0x144   :  { %v569_v33 = vsel %vm563_vm10, %v552_v4, %v554_v31  ;;  %v570_v34 = vsel %vm563_vm10, %v554_v31, %v556_v26  ;;  %v628_v37 = vsel %vm185_vm1, %v2286_v62, %v614_v35  ;;  %v869_v31 = vld [vmem:[#allocation2 + $0x78] sm:$0xff] }
 0x145   :  { %v1652_v38 = vpack.c.bf16 %v569_v33, %v564_v24  ;;  %v1682_v47 = vpack.c.bf16 %v570_v34, %v565_v25  ;;  %v1686_v57 = vpack.c.bf16 %v628_v37, %v623_v30  ;;  %v861_v30 = vld [vmem:[#allocation2 + $0x38] sm:$0xff] }
 0x147   :  { %v2350_v42 = vpop.permute.xlu1 %557  ;;  %1653 = vmatprep.subr.bf16.mxu0 %v1652_v38  ;;  %v662_v45 = vpop.permute.xlu0 %661 }
 0x148   :  { %v571_v44 = vsel %vm563_vm10, %v556_v26, %v2350_v42  ;;  %1655 = vmatpush1.bf16.msra.mxu0 %v1654_v40 }
 0x149   :  { %1657 = vmatprep.subr.bf16.mxu0 %v1656_v43  ;;  %v1680_v46 = vpack.c.bf16 %v571_v44, %v566_v28  ;;  %v877_v44 = vld [vmem:[#allocation2 + $0xb8] sm:$0xff] }
 0x14b   :  { %v2354_v48 = vpop.permute.xlu1 %603  ;;  %1681 = vmatprep.subr.bf16.mxu1 %v1680_v46  ;;  %v674_v50 = vpop.permute.xlu0 %673 }
 0x14c   :  { %v624_v49 = vsel %vm185_vm1, %v602_v29, %v2354_v48  ;;  %1683 = vmatpush1.bf16.msra.mxu1 %v1682_v47  ;;  %1659 = vmatpush1.bf16.msra.mxu0 %v1931_v51  ;;  %v867_v47 = vld [vmem:[#allocation2 + $0x68] sm:$0xff] }
 0x14f   :  { %v2359_v52 = vpop.permute.xlu1 %615  ;;  %v660_v54 = vpop.permute.xlu0 %659 }
 0x150   :  { %v629_v53 = vsel %vm185_vm1, %v614_v35, %v2359_v52  ;;  %v684_v55 = vsel %vm683_vm4, %v660_v54, %v662_v45  ;;  %707 = vst.msk [vmem:[#allocation2 + $0x208] sm:$0xff] %vm706_vm5, %v660_v54 }
 0x151   :  { %v1684_v56 = vpack.c.bf16 %v629_v53, %v624_v49 }
 0x153   :  { %v2365_v58 = vpop.permute.xlu1 %663  ;;  %1685 = vmatprep.subr.bf16.mxu1 %v1684_v56  ;;  %v723_v62 = vpop.permute.xlu0 %722 }
 0x154   :  { %v685_v59 = vsel %vm683_vm4, %v662_v45, %v2365_v58  ;;  %1687 = vmatpush1.bf16.msra.mxu1 %v1686_v57  ;;  %v885_v45 = vld [vmem:[#allocation2 + $0xf8] sm:$0xff]  ;;  %v1700_v57 = vpack.c.bf16 %v867_v47, %v2256_v61 }
 0x155   :  { %v1732_v56 = vpack.c.bf16 %v885_v45, %v877_v44  ;;  %v925_v45 = vld [vmem:[#allocation2 + $0x238] sm:$0xff] }
 0x157   :  { %v2369_v63 = vpop.permute.xlu1 %675  ;;  %v735_v1 = vpop.permute.xlu0 %734  ;;  %v919_v13 = vld [vmem:[#allocation2 + $0x208] sm:$0xff] }
 0x158   :  { %v690_v0 = vsel %vm683_vm4, %v674_v50, %v2369_v63 }
 0x159   :  { %v1688_v2 = vpack.c.bf16 %v690_v0, %v685_v59  ;;  %v2423_v59 = vld [vmem:[%s2773_s0] sm:$0xff]  ;;  %v901_v0 = vld [vmem:[#allocation2 + $0x178] sm:$0xff] }
 0x15b   :  { %v672_v3 = vpop.permute.xlu1 %671  ;;  %1689 = vmatprep.subr.bf16.mxu1 %v1688_v2  ;;  %v721_v5 = vpop.permute.xlu0 %720 }
 0x15c   :  { %v689_v4 = vsel %vm683_vm4, %v672_v3, %v674_v50  ;;  %714 = vst.msk [vmem:[#allocation2 + $0x248] sm:$0xff] %vm706_vm5, %v672_v3  ;;  %v745_v7 = vsel %vm744_vm6, %v721_v5, %v723_v62 }
 0x15d   :  { %769 = vst.msk [vmem:[#allocation2 + $0x288] sm:$0xff] %vm250_vm15, %v721_v5  ;;  %v1690_v8 = vpack.c.bf16 %v689_v4, %v684_v55  ;;  %v866_v55 = vld [vmem:[#allocation2 + $0x60] sm:$0xff]  ;;  %v909_v5 = vld [vmem:[#allocation2 + $0x1b8] sm:$0xff] }
 0x15e   :  { %v1702_v3 = vpack.c.bf16 %v866_v55, %v2242_v60 }
 0x15f   :  { %v2377_v9 = vpop.permute.xlu1 %724  ;;  %1691 = vmatpush1.bf16.msra.mxu1 %v1690_v8  ;;  %v785_v11 = vpop.permute.xlu0 %784  ;;  %v2441_v8 = vld [vmem:[%s2773_s0 + $0x8] sm:$0xff] }
 0x160   :  { %v746_v10 = vsel %vm744_vm6, %v723_v62, %v2377_v9  ;;  %831 = vst.msk [vmem:[#allocation2 + $0x310] sm:$0xff] %vm830_vm7, %v785_v11  ;;  %v893_v62 = vld [vmem:[#allocation2 + $0x138] sm:$0xff] }
 0x161   :  { %v1736_v4 = vpack.c.bf16 %v901_v0, %v893_v62 }
 0x163   :  { %v2381_v12 = vpop.permute.xlu1 %736  ;;  %v927_v14 = vld [vmem:[#allocation2 + $0x248] sm:$0xff]  ;;  %v797_v16 = vpop.permute.xlu0 %796 }
 0x164   :  { %v751_v15 = vsel %vm744_vm6, %v735_v1, %v2381_v12  ;;  %v1660_v17 = vpack.c.bf16 %v927_v14, %v919_v13  ;;  %837 = vst.msk [vmem:[#allocation2 + $0x350] sm:$0xff] %vm830_vm7, %v797_v16  ;;  %v935_v33 = vld [vmem:[#allocation2 + $0x288] sm:$0xff]  ;;  %v2457_v14 = vld [vmem:[%s2773_s0 + $0x10] sm:$0xff] }
 0x165   :  { %v1692_v19 = vpack.c.bf16 %v751_v15, %v746_v10 }
 0x166   :  { %1661 = vmatprep.subr.bf16.mxu0 %v1660_v17 }
 0x167   :  { %v733_v20 = vpop.permute.xlu1 %732  ;;  %1663 = vmatpush1.bf16.msra.mxu0 %v1931_v51  ;;  %1693 = vmatprep.subr.bf16.mxu1 %v1692_v19  ;;  %v488_v22 = vpop.permute.xlu0 %487  ;;  %v952_v40 = vld [vmem:[#allocation2 + $0x310] sm:$0xff] }
 0x168   :  { %v750_v21 = vsel %vm744_vm6, %v733_v20, %v735_v1  ;;  %777 = vst.msk [vmem:[#allocation2 + $0x2c8] sm:$0xff] %vm250_vm15, %v733_v20  ;;  %v2390_v23 = vsel %vm136_vm8, %v2314_v6, %v488_v22  ;;  %vm531_vm15 = vcmask 654336  }
 0x169   :  { %v1694_v24 = vpack.c.bf16 %v750_v21, %v745_v7  ;;  %v917_v7 = vld [vmem:[#allocation2 + $0x1f8] sm:$0xff] }
 0x16a   :  { %v1740_v13 = vpack.c.bf16 %v917_v7, %v909_v5 }
 0x16b   :  { %v2392_v25 = vpop.permute.xlu1 %786  ;;  %1695 = vmatpush1.bf16.msra.mxu1 %v1694_v24  ;;  %v500_v28 = vpop.permute.xlu0 %499  ;;  %v960_v6 = vld [vmem:[#allocation2 + $0x350] sm:$0xff] }
 0x16c   :  { %v808_v26 = vsel %vm252_vm0, %v785_v11, %v2392_v25  ;;  %v2398_v29 = vsel %vm136_vm8, %v2329_v18, %v500_v28  ;;  %v1728_v18 = vpack.c.bf16 %v869_v31, %v861_v30  ;;  %v1698_v43 = vpack.c.bf16 %v960_v6, %v952_v40 }
 0x16d   :  { %v1706_v21 = vpack.c.bf16 %v2398_v29, %v2390_v23 }
 0x16f   :  { %v2400_v32 = vpop.permute.xlu1 %798  ;;  %v943_v34 = vld [vmem:[#allocation2 + $0x2c8] sm:$0xff]  ;;  %v548_v36 = vpop.permute.xlu0 %547 }
 0x170   :  { %v813_v35 = vsel %vm252_vm0, %v797_v16, %v2400_v32  ;;  %v1664_v37 = vpack.c.bf16 %v943_v34, %v935_v33  ;;  %v2406_v38 = vsel %vm563_vm10, %v2339_v27, %v548_v36  ;;  %v2411_v27 = vld [vmem:[#allocation2 + $0x30] sm:$0xff] }
 0x171   :  { %v1696_v39 = vpack.c.bf16 %v813_v35, %v808_v26  ;;  %v1730_v53 = vpack.c.bf16 %v868_v41, %v2411_v27 }
 0x172   :  { %1665 = vmatprep.subr.bf16.mxu0 %v1664_v37 }
 0x173   :  { %v490_v46 = vpop.permute.xlu1 %489  ;;  %1667 = vmatpush1.bf16.msra.mxu0 %v1931_v51  ;;  %1697 = vmatprep.subr.bf16.mxu1 %v1696_v39  ;;  %v560_v50 = vpop.permute.xlu0 %559 }
 0x174   :  { %v507_v49 = vsel %vm136_vm8, %v488_v22, %v490_v46  ;;  %1669 = vmatprep.subr.bf16.mxu0 %v1931_v51  ;;  %1699 = vmatpush1.bf16.msra.mxu1 %v1698_v43  ;;  %v2417_v54 = vsel %vm563_vm10, %v2350_v42, %v560_v50  ;;  %v933_v46 = vld [vmem:[#allocation2 + $0x278] sm:$0xff] }
 0x175   :  { %532 = vst.msk [vmem:[#allocation2 + $0xa8] sm:$0xff] %vm531_vm15, %v507_v49  ;;  %1729 = vmatprep.subr.bf16.mxu1 %v1728_v18  ;;  %v1710_v35 = vpack.c.bf16 %v2417_v54, %v2406_v38  ;;  %v1744_v55 = vpack.c.bf16 %v933_v46, %v925_v45 }
 0x177   :  { %v502_v1 = vpop.permute.xlu1 %501  ;;  %1671 = vmatpush1.bf16.msra.mxu0 %v1931_v51  ;;  %1600 = vmatmul.mubr.msk.f32.vlgmr.msra.gmra.mrb[0].mxu1 %vm966_vm9, %v2423_v59  ;;  %v606_v2 = vpop.permute.xlu0 %605 }
 0x178   :  { %v512_v42 = vsel %vm136_vm8, %v500_v28, %v502_v1  ;;  %1701 = vmatprep.subr.bf16.mxu0 %v1700_v57  ;;  %1731 = vmatpush1.bf16.msra.mxu1 %v1730_v53  ;;  %v2432_v61 = vsel %vm185_vm1, %v2354_v48, %v606_v2  ;;  %vm651_vm8 = vcmask 343040  }
 0x179   :  { %538 = vst.msk [vmem:[#allocation2 + $0xe8] sm:$0xff] %vm531_vm15, %v512_v42  ;;  %1733 = vmatprep.subr.bf16.mxu1 %v1732_v56  ;;  %1138 = vmatprep.mubr.f32.mxu1 %v2411_v27 }
 0x17a   :  { %1596 = vmatmul.mubr.msk.f32.vlgmr.msra.gmra.mrb[0].mxu0 %vm966_vm9, %v2423_v59 }
 0x17b   :  { %v550_v10 = vpop.permute.xlu1 %549  ;;  %1703 = vmatpush1.bf16.msra.mxu0 %v1702_v3  ;;  %1049 = vmatprep.mubr.f32.mxu0 %v2411_v27  ;;  %v618_v48 = vpop.permute.xlu0 %617 }
 0x17c   :  { %v568_v60 = vsel %vm563_vm10, %v548_v36, %v550_v10  ;;  %1735 = vmatpush1.bf16.msra.mxu1 %v1931_v51  ;;  %v630_v11 = vsel %vm185_vm1, %v2359_v52, %v618_v48  ;;  %v875_v17 = vld [vmem:[#allocation2 + $0xa8] sm:$0xff] }
 0x17d   :  { %592 = vst.msk [vmem:[#allocation2 + $0x128] sm:$0xff] %vm591_vm11, %v568_v60  ;;  %1737 = vmatprep.subr.bf16.mxu1 %v1736_v4  ;;  %1601 = vmatmul.mubr.msk.f32.gmra.mrb[2].mxu1 %vm966_vm9, %v2441_v8  ;;  %v1714_v18 = vpack.c.bf16 %v630_v11, %v2432_v61 }
 0x17e   :  { %1597 = vmatmul.mubr.msk.f32.gmra.mrb[2].mxu0 %vm966_vm9, %v2441_v8  ;;  %1144 = vmatprep.mubr.f32.mxu1 %v2411_v27 }
 0x17f   :  { %v562_v15 = vpop.permute.xlu1 %561  ;;  %1055 = vmatprep.mubr.f32.mxu0 %v2411_v27  ;;  %v610_v16 = vpop.permute.xlu0 %609 }
 0x180   :  { %v573_v52 = vsel %vm563_vm10, %v560_v50, %v562_v15  ;;  %v883_v19 = vld [vmem:[#allocation2 + $0xe8] sm:$0xff]  ;;  %1739 = vmatpush1.bf16.msra.mxu1 %v1931_v51  ;;  %v2473_v51 = vld [vmem:[%s2773_s0 + $0x18] sm:$0x1] }
 0x181   :  { %598 = vst.msk [vmem:[#allocation2 + $0x168] sm:$0xff] %vm591_vm11, %v573_v52  ;;  %v1704_v20 = vpack.c.bf16 %v883_v19, %v875_v17  ;;  %1741 = vmatprep.subr.bf16.mxu1 %v1740_v13  ;;  %1602 = vmatmul.mubr.msk.f32.gmra.mrb[4].mxu1 %vm966_vm9, %v2457_v14 }
 0x182   :  { %1598 = vmatmul.mubr.msk.f32.gmra.mrb[4].mxu0 %vm966_vm9, %v2457_v14  ;;  %1150 = vmatprep.mubr.f32.mxu1 %v2411_v27 }
 0x183   :  { %v608_v22 = vpop.permute.xlu1 %607  ;;  %1705 = vmatprep.subr.bf16.mxu0 %v1704_v20  ;;  %1061 = vmatprep.mubr.f32.mxu0 %v2411_v27  ;;  %v666_v28 = vpop.permute.xlu0 %665 }
 0x184   :  { %v626_v24 = vsel %vm185_vm1, %v606_v2, %v608_v22  ;;  %v627_v26 = vsel %vm185_vm1, %v608_v22, %v610_v16  ;;  %1707 = vmatpush1.bf16.msra.mxu0 %v1706_v21  ;;  %v686_v23 = vsel %vm683_vm4, %v2365_v58, %v666_v28  ;;  %v891_v33 = vld [vmem:[#allocation2 + $0x128] sm:$0xff] }
 0x185   :  { %652 = vst.msk [vmem:[#allocation2 + $0x1b0] sm:$0xff] %vm651_vm8, %v627_v26  ;;  %1603 = vmatmul.mubr.msk.f32.gmra.mrb[6].mxu1 %vm966_vm9, %v2473_v51 }
 0x186   :  { %1599 = vmatmul.mubr.msk.f32.gmra.mrb[6].mxu0 %vm966_vm9, %v2473_v51  ;;  %1310 = vmatprep.mubr.f32.mxu1 %v2411_v27 }
 0x187   :  { %v620_v29 = vpop.permute.xlu1 %619  ;;  %1221 = vmatprep.mubr.f32.mxu0 %v2411_v27  ;;  %v678_v31 = vpop.permute.xlu0 %677 }
 0x188   :  { %v631_v30 = vsel %vm185_vm1, %v618_v48, %v620_v29  ;;  %v899_v34 = vld [vmem:[#allocation2 + $0x168] sm:$0xff]  ;;  %v691_v6 = vsel %vm683_vm4, %v2369_v63, %v678_v31 }
 0x189   :  { %v1708_v58 = vpack.c.bf16 %v899_v34, %v891_v33  ;;  %v1712_v37 = vpack.c.bf16 %v631_v30, %v626_v24  ;;  %v1718_v0 = vpack.c.bf16 %v691_v6, %v686_v23 }
 0x18b   :  { %v622_v36 = vpop.permute.xlu1 %621  ;;  %1709 = vmatprep.subr.bf16.mxu0 %v1708_v58  ;;  %v670_v40 = vpop.permute.xlu0 %669 }
 0x18c   :  { %v632_v39 = vsel %vm185_vm1, %v620_v29, %v622_v36  ;;  %1711 = vmatpush1.bf16.msra.mxu0 %v1710_v35  ;;  %v908_v53 = vld [vmem:[#allocation2 + $0x1b0] sm:$0xff]  ;;  %vm775_vm1 = vcmask 31744  }
 0x18d   :  { %658 = vst.msk [vmem:[#allocation2 + $0x1f0] sm:$0xff] %vm651_vm8, %v632_v39  ;;  %1713 = vmatprep.subr.bf16.mxu0 %v1712_v37 }
 0x18f   :  { %v668_v41 = vpop.permute.xlu1 %667  ;;  %v727_v44 = vpop.permute.xlu0 %726 }
 0x190   :  { %v687_v63 = vsel %vm683_vm4, %v666_v28, %v668_v41  ;;  %v688_v43 = vsel %vm683_vm4, %v668_v41, %v670_v40  ;;  %1715 = vmatpush1.bf16.msra.mxu0 %v1714_v18  ;;  %v747_v38 = vsel %vm744_vm6, %v2377_v9, %v727_v44 }
 0x191   :  { %713 = vst.msk [vmem:[#allocation2 + $0x230] sm:$0xff] %vm712_vm12, %v688_v43 }
 0x193   :  { %v680_v47 = vpop.permute.xlu1 %679  ;;  %v739_v50 = vpop.permute.xlu0 %738 }
 0x194   :  { %v692_v49 = vsel %vm683_vm4, %v678_v31, %v680_v47  ;;  %v916_v54 = vld [vmem:[#allocation2 + $0x1f0] sm:$0xff]  ;;  %v752_v56 = vsel %vm744_vm6, %v2381_v12, %v739_v50 }
 0x195   :  { %v1742_v57 = vpack.c.bf16 %v916_v54, %v908_v53  ;;  %v1716_v62 = vpack.c.bf16 %v692_v49, %v687_v63  ;;  %v1722_v15 = vpack.c.bf16 %v752_v56, %v747_v38 }
 0x197   :  { %v682_v1 = vpop.permute.xlu1 %681  ;;  %1743 = vmatpush1.bf16.msra.mxu1 %v1742_v57  ;;  %1717 = vmatprep.subr.bf16.mxu0 %v1716_v62  ;;  %v731_v42 = vpop.permute.xlu0 %730 }
 0x198   :  { %v693_v9 = vsel %vm683_vm4, %v680_v47, %v682_v1  ;;  %1719 = vmatpush1.bf16.msra.mxu0 %v1718_v0  ;;  %1745 = vmatprep.subr.bf16.mxu1 %v1744_v55  ;;  %776 = vst.msk [vmem:[#allocation2 + $0x2b8] sm:$0xff] %vm775_vm1, %v731_v42  ;;  %v924_v60 = vld [vmem:[#allocation2 + $0x230] sm:$0xff] }
 0x199   :  { %719 = vst.msk [vmem:[#allocation2 + $0x270] sm:$0xff] %vm712_vm12, %v693_v9 }
 0x19b   :  { %v729_v2 = vpop.permute.xlu1 %728  ;;  %v789_v3 = vpop.permute.xlu0 %788 }
 0x19c   :  { %v748_v61 = vsel %vm744_vm6, %v727_v44, %v729_v2  ;;  %v749_v12 = vsel %vm744_vm6, %v729_v2, %v731_v42  ;;  %v809_v4 = vsel %vm252_vm0, %v2392_v25, %v789_v3 }
 0x19f   :  { %v741_v5 = vpop.permute.xlu1 %740  ;;  %v793_v10 = vpop.permute.xlu0 %792  ;;  %v941_v24 = vld [vmem:[#allocation2 + $0x2b8] sm:$0xff] }
 0x1a0   :  { %v753_v7 = vsel %vm744_vm6, %v739_v50, %v741_v5  ;;  %v932_v48 = vld [vmem:[#allocation2 + $0x270] sm:$0xff] }
 0x1a1   :  { %v1746_v11 = vpack.c.bf16 %v932_v48, %v924_v60  ;;  %v1720_v13 = vpack.c.bf16 %v753_v7, %v748_v61 }
 0x1a3   :  { %v743_v52 = vpop.permute.xlu1 %742  ;;  %1747 = vmatpush1.bf16.msra.mxu1 %v1746_v11  ;;  %1721 = vmatprep.subr.bf16.mxu0 %v1720_v13  ;;  %v801_v17 = vpop.permute.xlu0 %800 }
 0x1a4   :  { %v754_v16 = vsel %vm744_vm6, %v741_v5, %v743_v52  ;;  %783 = vst.msk [vmem:[#allocation2 + $0x2f8] sm:$0xff] %vm775_vm1, %v743_v52  ;;  %1723 = vmatpush1.bf16.msra.mxu0 %v1722_v15  ;;  %v814_v25 = vsel %vm252_vm0, %v2400_v32, %v801_v17 }
 0x1a5   :  { %v1750_v29 = vpack.c.bf16 %v754_v16, %v749_v12  ;;  %v1726_v6 = vpack.c.bf16 %v814_v25, %v809_v4 }
 0x1a7   :  { %v791_v19 = vpop.permute.xlu1 %790  ;;  %v805_v30 = vpop.permute.xlu0 %804 }
 0x1a8   :  { %v810_v20 = vsel %vm252_vm0, %v789_v3, %v791_v19  ;;  %v811_v21 = vsel %vm252_vm0, %v791_v19, %v793_v10 }
 0x1ab   :  { %v795_v22 = vpop.permute.xlu1 %794  ;;  %v949_v26 = vld [vmem:[#allocation2 + $0x2f8] sm:$0xff] }
 0x1ac   :  { %v812_v28 = vsel %vm252_vm0, %v793_v10, %v795_v22  ;;  %v1748_v23 = vpack.c.bf16 %v949_v26, %v941_v24 }
 0x1ad   :  { %836 = vst.msk [vmem:[#allocation2 + $0x338] sm:$0xff] %vm18_vm2, %v812_v28 }
 0x1ae   :  { %1749 = vmatprep.subr.bf16.mxu1 %v1748_v23 }
 0x1af   :  { %v803_v31 = vpop.permute.xlu1 %802  ;;  %1751 = vmatpush1.bf16.msra.mxu1 %v1750_v29 }
 0x1b0   :  { %v815_v32 = vsel %vm252_vm0, %v801_v17, %v803_v31  ;;  %v816_v33 = vsel %vm252_vm0, %v803_v31, %v805_v30 }
 0x1b1   :  { %v1724_v34 = vpack.c.bf16 %v815_v32, %v810_v20  ;;  %v1754_v40 = vpack.c.bf16 %v816_v33, %v811_v21 }
 0x1b3   :  { %v807_v58 = vpop.permute.xlu1 %806  ;;  %1725 = vmatprep.subr.bf16.mxu0 %v1724_v34 }
 0x1b4   :  { %v817_v35 = vsel %vm252_vm0, %v805_v30, %v807_v58  ;;  %1727 = vmatpush1.bf16.msra.mxu0 %v1726_v6  ;;  %v957_v36 = vld [vmem:[#allocation2 + $0x338] sm:$0xff]  ;;  %vm1590_vm0 = vcmask 393216  }
 0x1b5   :  { %842 = vst.msk [vmem:[#allocation2 + $0x378] sm:$0xff] %vm18_vm2, %v817_v35 }
 0x1b7   :  { %1604 = vmatmul.mubr.msk.f32.vlgmr.msra.gmra.mrb[8].mxu0 %vm966_vm9, %v2423_v59 }
 0x1b8   :  { %1227 = vmatprep.mubr.f32.mxu0 %v2411_v27 }
 0x1bb   :  { %1605 = vmatmul.mubr.msk.f32.gmra.mrb[10].mxu0 %vm966_vm9, %v2441_v8 }
 0x1bc   :  { %v965_v37 = vld [vmem:[#allocation2 + $0x378] sm:$0xff]  ;;  %1233 = vmatprep.mubr.f32.mxu0 %v2411_v27 }
 0x1bd   :  { %v1752_v39 = vpack.c.bf16 %v965_v37, %v957_v36 }
 0x1bf   :  { %1753 = vmatprep.subr.bf16.mxu1 %v1752_v39  ;;  %1606 = vmatmul.mubr.msk.f32.gmra.mrb[12].mxu0 %vm966_vm9, %v2457_v14 }
 0x1c0   :  { %1755 = vmatpush1.bf16.msra.mxu1 %v1754_v40  ;;  %1239 = vmatprep.mubr.f32.mxu0 %v2411_v27 }
 0x1c3   :  { %1608 = vmatmul.mubr.msk.f32.vlgmr.msra.gmra.mrb[8].mxu1 %vm966_vm9, %v2423_v59  ;;  %1607 = vmatmul.mubr.msk.f32.gmra.mrb[14].mxu0 %vm966_vm9, %v2473_v51 }
 0x1c4   :  { %1316 = vmatprep.mubr.f32.mxu1 %v2411_v27 }
 0x1c7   :  { %1609 = vmatmul.mubr.msk.f32.gmra.mrb[10].mxu1 %vm966_vm9, %v2441_v8 }
 0x1c8   :  { %1322 = vmatprep.mubr.f32.mxu1 %v2411_v27 }
 0x1cb   :  { %1610 = vmatmul.mubr.msk.f32.gmra.mrb[12].mxu1 %vm966_vm9, %v2457_v14 }
 0x1cc   :  { %1328 = vmatprep.mubr.f32.mxu1 %v2411_v27 }
 0x1cf   :  { %1611 = vmatmul.mubr.msk.f32.gmra.mrb[14].mxu1 %vm966_vm9, %v2473_v51 }
 0x24a   :  { %v2545_v18 = vpop.f32.mrb[0].mxu1 }
 0x24b   :  { %v1614_v59 = vmul.f32 -1.442695, %v2545_v18  ;;  %v2548_v41 = vpop.f32.mrb[1].mxu1 }
 0x24c   :  { %v1615_v63 = vmul.f32 -1.442695, %v2548_v41 }
 0x24d   :  { %v2551_v43 = vpop.f32.mrb[0].mxu0  ;;  %1779 = vpow2.f32 %v1614_v59 }
 0x24e   :  { %v1612_v8 = vmul.f32 -1.442695, %v2551_v43  ;;  %v2554_v44 = vpop.f32.mrb[1].mxu0  ;;  %1781 = vpow2.f32 %v1615_v63 }
 0x24f   :  { %v1613_v27 = vmul.f32 -1.442695, %v2554_v44 }
 0x250   :  { %1783 = vpow2.f32 %v1612_v8  ;;  %v2557_v14 = vpop.f32.mrb[2].mxu1 }
 0x251   :  { %1785 = vpow2.f32 %v1613_v27  ;;  %v2559_v51 = vpop.f32.mrb[2].mxu0  ;;  %v1622_v38 = vmul.f32 -1.442695, %v2557_v14  ;;  %v2562_v45 = vpop.f32.mrb[3].mxu1 }
 0x252   :  { %v1620_v46 = vmul.f32 -1.442695, %v2559_v51  ;;  %v2565_v47 = vpop.f32.mrb[3].mxu0  ;;  %v1623_v49 = vmul.f32 -1.442695, %v2562_v45 }
 0x253   :  { %1787 = vpow2.f32 %v1622_v38  ;;  %v1621_v50 = vmul.f32 -1.442695, %v2565_v47 }
 0x254   :  { %1789 = vpow2.f32 %v1620_v46  ;;  %v2569_v53 = vpop.f32.mrb[4].mxu1 }
 0x255   :  { %1791 = vpow2.f32 %v1621_v50  ;;  %v2571_v54 = vpop.f32.mrb[4].mxu0  ;;  %v1630_v55 = vmul.f32 -1.442695, %v2569_v53  ;;  %v2574_v56 = vpop.f32.mrb[5].mxu1 }
 0x256   :  { %1793 = vpow2.f32 %v1623_v49  ;;  %v1628_v57 = vmul.f32 -1.442695, %v2571_v54  ;;  %v2577_v62 = vpop.f32.mrb[5].mxu0  ;;  %v1631_v2 = vmul.f32 -1.442695, %v2574_v56 }
 0x257   :  { %v1780_v0 = vpop.eup %1779  ;;  %1795 = vpow2.f32 %v1630_v55  ;;  %v1629_v1 = vmul.f32 -1.442695, %v2577_v62 }
 0x258   :  { %v1782_v9 = vpop.eup %1781  ;;  %v1433_v42 = vadd.f32 1.0, %v1780_v0  ;;  %1797 = vpow2.f32 %v1628_v57  ;;  %v2581_v61 = vpop.f32.mrb[6].mxu1 }
 0x259   :  { %v1434_v12 = vadd.f32 1.0, %v1782_v9  ;;  %1799 = vpow2.f32 %v1629_v1  ;;  %v2583_v3 = vpop.f32.mrb[6].mxu0  ;;  %v2585_v4 = vpop.f32.mrb[7].mxu1  ;;  %v1638_v23 = vmul.f32 -1.442695, %v2581_v61 }
 0x25a   :  { %v1784_v5 = vpop.eup %1783  ;;  %1801 = vrcp.f32 %v1433_v42  ;;  %v2587_v7 = vpop.f32.mrb[7].mxu0  ;;  %v1636_v48 = vmul.f32 -1.442695, %v2583_v3  ;;  %v1639_v58 = vmul.f32 -1.442695, %v2585_v4 }
 0x25b   :  { %v1786_v10 = vpop.eup %1785  ;;  %v1431_v60 = vadd.f32 1.0, %v1784_v5  ;;  %1803 = vrcp.f32 %v1434_v12  ;;  %v1637_v31 = vmul.f32 -1.442695, %v2587_v7 }
 0x25c   :  { %v1432_v11 = vadd.f32 1.0, %v1786_v10  ;;  %1805 = vpow2.f32 %v1631_v2 }
 0x25d   :  { %v1788_v13 = vpop.eup %1787  ;;  %1807 = vrcp.f32 %v1431_v60 }
 0x25e   :  { %v1790_v15 = vpop.eup %1789  ;;  %1809 = vrcp.f32 %v1432_v11  ;;  %v1441_v52 = vadd.f32 1.0, %v1788_v13 }
 0x25f   :  { %v1792_v16 = vpop.eup %1791  ;;  %v1439_v17 = vadd.f32 1.0, %v1790_v15  ;;  %1811 = vpow2.f32 %v1636_v48 }
 0x260   :  { %v1794_v25 = vpop.eup %1793  ;;  %1813 = vrcp.f32 %v1441_v52  ;;  %v1440_v19 = vadd.f32 1.0, %v1792_v16 }
 0x261   :  { %v1796_v20 = vpop.eup %1795  ;;  %1815 = vrcp.f32 %v1439_v17  ;;  %v1442_v21 = vadd.f32 1.0, %v1794_v25 }
 0x262   :  { %v1798_v22 = vpop.eup %1797  ;;  %1817 = vrcp.f32 %v1440_v19  ;;  %v1449_v24 = vadd.f32 1.0, %v1796_v20 }
 0x263   :  { %v1800_v26 = vpop.eup %1799  ;;  %1819 = vrcp.f32 %v1442_v21  ;;  %v1447_v28 = vadd.f32 1.0, %v1798_v22 }
 0x264   :  { %v1802_v29 = vpop.eup %1801  ;;  %1821 = vrcp.f32 %v1449_v24  ;;  %v1448_v30 = vadd.f32 1.0, %v1800_v26 }
 0x265   :  { %v1804_v32 = vpop.eup %1803  ;;  %v1529_v33 = vmul.f32 %v1802_v29, %v2545_v18  ;;  %1823 = vrcp.f32 %v1447_v28 }
 0x266   :  { %v1806_v34 = vpop.eup %1805  ;;  %v1530_v6 = vmul.f32 %v1804_v32, %v2548_v41  ;;  %1825 = vrcp.f32 %v1448_v30 }
 0x267   :  { %v1808_v35 = vpop.eup %1807  ;;  %1561 = vst [vmem:[%s2774_s2 + $0x10] sm:$0xff] %v1529_v33  ;;  %v1450_v36 = vadd.f32 1.0, %v1806_v34  ;;  %1827 = vpow2.f32 %v1638_v23 }
 0x268   :  { %v1810_v37 = vpop.eup %1809  ;;  %v1527_v39 = vmul.f32 %v1808_v35, %v2551_v43  ;;  %1562 = vst [vmem:[%s2774_s2 + $0x18] sm:$0xff] %v1530_v6  ;;  %1829 = vpow2.f32 %v1637_v31 }
 0x269   :  { %v1812_v40 = vpop.eup %1811  ;;  %v1528_v18 = vmul.f32 %v1810_v37, %v2554_v44  ;;  %1831 = vrcp.f32 %v1450_v36 }
 0x26a   :  { %v1814_v59 = vpop.eup %1813  ;;  %1559 = vst [vmem:[%s2774_s2] sm:$0xff] %v1527_v39  ;;  %v1455_v41 = vadd.f32 1.0, %v1812_v40  ;;  %1833 = vpow2.f32 %v1639_v58 }
 0x26b   :  { %v1816_v63 = vpop.eup %1815  ;;  %1560 = vst [vmem:[%s2774_s2 + $0x8] sm:$0xff] %v1528_v18  ;;  %v1537_v43 = vmul.f32 %v1814_v59, %v2557_v14 }
 0x26c   :  { %v1818_v8 = vpop.eup %1817  ;;  %v1535_v27 = vmul.f32 %v1816_v63, %v2559_v51  ;;  %1835 = vrcp.f32 %v1455_v41 }
 0x26d   :  { %v1820_v44 = vpop.eup %1819  ;;  %1569 = vst [vmem:[%s2774_s2 + $0x50] sm:$0xff] %v1537_v43  ;;  %v1536_v38 = vmul.f32 %v1818_v8, %v2565_v47 }
 0x26e   :  { %v1822_v46 = vpop.eup %1821  ;;  %1567 = vst [vmem:[%s2774_s2 + $0x40] sm:$0xff] %v1535_v27  ;;  %v1538_v49 = vmul.f32 %v1820_v44, %v2562_v45 }
 0x26f   :  { %v1824_v50 = vpop.eup %1823  ;;  %1568 = vst [vmem:[%s2774_s2 + $0x48] sm:$0xff] %v1536_v38  ;;  %v1545_v14 = vmul.f32 %v1822_v46, %v2569_v53 }
 0x270   :  { %v1826_v51 = vpop.eup %1825  ;;  %1570 = vst [vmem:[%s2774_s2 + $0x58] sm:$0xff] %v1538_v49  ;;  %v1543_v47 = vmul.f32 %v1824_v50, %v2571_v54 }
 0x271   :  { %v1828_v55 = vpop.eup %1827  ;;  %1577 = vst [vmem:[%s2774_s2 + $0x90] sm:$0xff] %v1545_v14  ;;  %v1544_v45 = vmul.f32 %v1826_v51, %v2577_v62 }
 0x272   :  { %v1830_v57 = vpop.eup %1829  ;;  %1575 = vst [vmem:[%s2774_s2 + $0x80] sm:$0xff] %v1543_v47  ;;  %v1457_v53 = vadd.f32 1.0, %v1828_v55 }
 0x273   :  { %v1832_v0 = vpop.eup %1831  ;;  %1576 = vst [vmem:[%s2774_s2 + $0x88] sm:$0xff] %v1544_v45  ;;  %v1456_v1 = vadd.f32 1.0, %v1830_v57 }
 0x274   :  { %v1834_v54 = vpop.eup %1833  ;;  %v1546_v9 = vmul.f32 %v1832_v0, %v2574_v56  ;;  %1837 = vrcp.f32 %v1457_v53 }
 0x275   :  { %1839 = vrcp.f32 %v1456_v1  ;;  %v1458_v42 = vadd.f32 1.0, %v1834_v54 }
 0x276   :  { %v1836_v2 = vpop.eup %1835  ;;  %1578 = vst [vmem:[%s2774_s2 + $0x98] sm:$0xff] %v1546_v9 }
 0x277   :  { %v1551_v62 = vmul.f32 %v1836_v2, %v2583_v3  ;;  %1841 = vrcp.f32 %v1458_v42 }
 0x279   :  { %1583 = vst [vmem:[%s2774_s2 + $0xc0] sm:$0x1] %v1551_v62 }
 0x27e   :  { %v1838_v12 = vpop.eup %1837 }
 0x27f   :  { %v1840_v5 = vpop.eup %1839  ;;  %v1553_v10 = vmul.f32 %v1838_v12, %v2581_v61 }
 0x280   :  { %v1552_v56 = vmul.f32 %v1840_v5, %v2587_v7 }
 0x281   :  { %v1842_v60 = vpop.eup %1841  ;;  %1585 = vst [vmem:[%s2774_s2 + $0xd0] sm:$0x1] %v1553_v10 }
 0x282   :  { %1584 = vst [vmem:[%s2774_s2 + $0xc8] sm:$0x1] %v1552_v56  ;;  %v1554_v3 = vmul.f32 %v1842_v60, %v2585_v4 }
 0x284   :  { %1586 = vst [vmem:[%s2774_s2 + $0xd8] sm:$0x1] %v1554_v3 }
 0x28a   :  { %v2657_v48 = vpop.f32.mrb[8].mxu0 }
 0x28b   :  { %v1616_v61 = vmul.f32 -1.442695, %v2657_v48  ;;  %v2660_v7 = vpop.f32.mrb[9].mxu0 }
 0x28c   :  { %v1617_v11 = vmul.f32 -1.442695, %v2660_v7 }
 0x28d   :  { %1843 = vpow2.f32 %v1616_v61 }
 0x28e   :  { %1845 = vpow2.f32 %v1617_v11  ;;  %v2663_v13 = vpop.f32.mrb[10].mxu0 }
 0x28f   :  { %v1624_v15 = vmul.f32 -1.442695, %v2663_v13  ;;  %v2666_v52 = vpop.f32.mrb[11].mxu0 }
 0x290   :  { %v1625_v4 = vmul.f32 -1.442695, %v2666_v52 }
 0x291   :  { %1847 = vpow2.f32 %v1624_v15 }
 0x292   :  { %1849 = vpow2.f32 %v1625_v4  ;;  %v2669_v16 = vpop.f32.mrb[12].mxu0 }
 0x293   :  { %v1632_v17 = vmul.f32 -1.442695, %v2669_v16  ;;  %v2672_v25 = vpop.f32.mrb[13].mxu0 }
 0x294   :  { %v1633_v19 = vmul.f32 -1.442695, %v2672_v25 }
 0x295   :  { %1851 = vpow2.f32 %v1632_v17 }
 0x296   :  { %v2675_v20 = vpop.f32.mrb[8].mxu1  ;;  %1853 = vpow2.f32 %v1633_v19  ;;  %v2677_v21 = vpop.f32.mrb[14].mxu0 }
 0x297   :  { %v1844_v22 = vpop.eup %1843  ;;  %v1618_v24 = vmul.f32 -1.442695, %v2675_v20  ;;  %v2680_v26 = vpop.f32.mrb[9].mxu1  ;;  %v1640_v39 = vmul.f32 -1.442695, %v2677_v21 }
 0x298   :  { %v2682_v28 = vpop.f32.mrb[15].mxu0  ;;  %v1846_v23 = vpop.eup %1845  ;;  %v1435_v29 = vadd.f32 1.0, %v1844_v22  ;;  %v1619_v30 = vmul.f32 -1.442695, %v2680_v26 }
 0x299   :  { %v1436_v31 = vadd.f32 1.0, %v1846_v23  ;;  %1855 = vpow2.f32 %v1618_v24  ;;  %v1641_v27 = vmul.f32 -1.442695, %v2682_v28 }
 0x29a   :  { %1857 = vrcp.f32 %v1435_v29  ;;  %v2685_v32 = vpop.f32.mrb[10].mxu1 }
 0x29b   :  { %v1848_v33 = vpop.eup %1847  ;;  %1859 = vrcp.f32 %v1436_v31  ;;  %v1626_v34 = vmul.f32 -1.442695, %v2685_v32  ;;  %v2688_v6 = vpop.f32.mrb[11].mxu1 }
 0x29c   :  { %v1850_v58 = vpop.eup %1849  ;;  %v1443_v35 = vadd.f32 1.0, %v1848_v33  ;;  %1861 = vpow2.f32 %v1619_v30  ;;  %v1627_v36 = vmul.f32 -1.442695, %v2688_v6 }
 0x29d   :  { %v1444_v37 = vadd.f32 1.0, %v1850_v58  ;;  %1863 = vpow2.f32 %v1626_v34 }
 0x29e   :  { %1865 = vrcp.f32 %v1443_v35  ;;  %v2692_v40 = vpop.f32.mrb[12].mxu1 }
 0x29f   :  { %v1852_v18 = vpop.eup %1851  ;;  %1867 = vrcp.f32 %v1444_v37  ;;  %v2694_v59 = vpop.f32.mrb[13].mxu1  ;;  %v1634_v43 = vmul.f32 -1.442695, %v2692_v40 }
 0x2a0   :  { %v1854_v41 = vpop.eup %1853  ;;  %v1451_v63 = vadd.f32 1.0, %v1852_v18  ;;  %1869 = vpow2.f32 %v1627_v36  ;;  %v1635_v46 = vmul.f32 -1.442695, %v2694_v59 }
 0x2a1   :  { %v1452_v8 = vadd.f32 1.0, %v1854_v41  ;;  %1871 = vpow2.f32 %v1640_v39 }
 0x2a2   :  { %1873 = vrcp.f32 %v1451_v63  ;;  %v2698_v44 = vpop.f32.mrb[14].mxu1 }
 0x2a3   :  { %v1856_v38 = vpop.eup %1855  ;;  %1875 = vrcp.f32 %v1452_v8  ;;  %v2701_v49 = vpop.f32.mrb[15].mxu1  ;;  %v1642_v51 = vmul.f32 -1.442695, %v2698_v44 }
 0x2a4   :  { %v1858_v50 = vpop.eup %1857  ;;  %v1437_v14 = vadd.f32 1.0, %v1856_v38  ;;  %1877 = vpow2.f32 %v1634_v43  ;;  %v1643_v1 = vmul.f32 -1.442695, %v2701_v49 }
 0x2a5   :  { %v1860_v47 = vpop.eup %1859  ;;  %v1531_v55 = vmul.f32 %v1858_v50, %v2657_v48  ;;  %1879 = vpow2.f32 %v1641_v27 }
 0x2a6   :  { %v1862_v45 = vpop.eup %1861  ;;  %v1532_v57 = vmul.f32 %v1860_v47, %v2660_v7  ;;  %1881 = vrcp.f32 %v1437_v14 }
 0x2a7   :  { %v1864_v53 = vpop.eup %1863  ;;  %1563 = vst [vmem:[%s2774_s2 + $0x20] sm:$0xff] %v1531_v55  ;;  %v1438_v0 = vadd.f32 1.0, %v1862_v45  ;;  %1883 = vpow2.f32 %v1635_v46 }
 0x2a8   :  { %v1866_v54 = vpop.eup %1865  ;;  %1564 = vst [vmem:[%s2774_s2 + $0x28] sm:$0xff] %v1532_v57  ;;  %v1445_v9 = vadd.f32 1.0, %v1864_v53  ;;  %1885 = vpow2.f32 %v1642_v51 }
 0x2a9   :  { %v1868_v42 = vpop.eup %1867  ;;  %v1539_v2 = vmul.f32 %v1866_v54, %v2663_v13  ;;  %1887 = vrcp.f32 %v1438_v0 }
 0x2aa   :  { %v1870_v62 = vpop.eup %1869  ;;  %v1540_v12 = vmul.f32 %v1868_v42, %v2666_v52  ;;  %1889 = vrcp.f32 %v1445_v9 }
 0x2ab   :  { %v1872_v5 = vpop.eup %1871  ;;  %1571 = vst [vmem:[%s2774_s2 + $0x60] sm:$0xff] %v1539_v2  ;;  %v1446_v10 = vadd.f32 1.0, %v1870_v62  ;;  %1891 = vpow2.f32 %v1643_v1 }
 0x2ac   :  { %v1874_v56 = vpop.eup %1873  ;;  %1572 = vst [vmem:[%s2774_s2 + $0x68] sm:$0xff] %v1540_v12  ;;  %v1459_v60 = vadd.f32 1.0, %v1872_v5 }
 0x2ad   :  { %v1876_v3 = vpop.eup %1875  ;;  %v1547_v48 = vmul.f32 %v1874_v56, %v2669_v16  ;;  %1893 = vrcp.f32 %v1446_v10 }
 0x2ae   :  { %v1878_v61 = vpop.eup %1877  ;;  %v1548_v7 = vmul.f32 %v1876_v3, %v2672_v25  ;;  %1895 = vrcp.f32 %v1459_v60 }
 0x2af   :  { %v1880_v11 = vpop.eup %1879  ;;  %1579 = vst [vmem:[%s2774_s2 + $0xa0] sm:$0xff] %v1547_v48  ;;  %v1453_v13 = vadd.f32 1.0, %v1878_v61 }
 0x2b0   :  { %v1882_v15 = vpop.eup %1881  ;;  %1580 = vst [vmem:[%s2774_s2 + $0xa8] sm:$0xff] %v1548_v7  ;;  %v1460_v52 = vadd.f32 1.0, %v1880_v11 }
 0x2b1   :  { %v1884_v4 = vpop.eup %1883  ;;  %v1533_v16 = vmul.f32 %v1882_v15, %v2675_v20  ;;  %1897 = vrcp.f32 %v1453_v13 }
 0x2b2   :  { %v1886_v17 = vpop.eup %1885  ;;  %1899 = vrcp.f32 %v1460_v52  ;;  %v1454_v25 = vadd.f32 1.0, %v1884_v4 }
 0x2b3   :  { %v1888_v19 = vpop.eup %1887  ;;  %1565 = vst [vmem:[%s2774_s2 + $0x30] sm:$0xff] %v1533_v16  ;;  %v1461_v22 = vadd.f32 1.0, %v1886_v17 }
 0x2b4   :  { %v1890_v24 = vpop.eup %1889  ;;  %v1534_v23 = vmul.f32 %v1888_v19, %v2680_v26  ;;  %1901 = vrcp.f32 %v1454_v25 }
 0x2b5   :  { %v1892_v29 = vpop.eup %1891  ;;  %v1541_v30 = vmul.f32 %v1890_v24, %v2685_v32  ;;  %1903 = vrcp.f32 %v1461_v22 }
 0x2b6   :  { %1566 = vst.msk [vmem:[%s2774_s2 + $0x38] sm:$0xff] %vm18_vm2, %v1534_v23  ;;  %v1462_v20 = vadd.f32 1.0, %v1892_v29 }
 0x2b7   :  { %v1894_v31 = vpop.eup %1893  ;;  %1573 = vst [vmem:[%s2774_s2 + $0x70] sm:$0xff] %v1541_v30 }
 0x2b8   :  { %v1896_v33 = vpop.eup %1895  ;;  %v1542_v34 = vmul.f32 %v1894_v31, %v2688_v6  ;;  %1905 = vrcp.f32 %v1462_v20 }
 0x2b9   :  { %v1555_v26 = vmul.f32 %v1896_v33, %v2677_v21 }
 0x2ba   :  { %1574 = vst.msk [vmem:[%s2774_s2 + $0x78] sm:$0xff] %vm18_vm2, %v1542_v34 }
 0x2bb   :  { %v1898_v32 = vpop.eup %1897  ;;  %1587 = vst [vmem:[%s2774_s2 + $0xe0] sm:$0x1] %v1555_v26 }
 0x2bc   :  { %v1900_v58 = vpop.eup %1899  ;;  %v1549_v35 = vmul.f32 %v1898_v32, %v2692_v40 }
 0x2bd   :  { %v1556_v36 = vmul.f32 %v1900_v58, %v2682_v28 }
 0x2be   :  { %v1902_v37 = vpop.eup %1901  ;;  %1581 = vst [vmem:[%s2774_s2 + $0xb0] sm:$0xff] %v1549_v35 }
 0x2bf   :  { %v1904_v21 = vpop.eup %1903  ;;  %1588 = vst [vmem:[%s2774_s2 + $0xe8] sm:$0x1] %v1556_v36  ;;  %v1550_v6 = vmul.f32 %v1902_v37, %v2694_v59 }
 0x2c0   :  { %v1557_v39 = vmul.f32 %v1904_v21, %v2698_v44 }
 0x2c1   :  { %1582 = vst.msk [vmem:[%s2774_s2 + $0xb8] sm:$0xff] %vm18_vm2, %v1550_v6 }
 0x2c2   :  { %v1906_v28 = vpop.eup %1905  ;;  %1589 = vst [vmem:[%s2774_s2 + $0xf0] sm:$0x1] %v1557_v39 }
 0x2c3   :  { %v1558_v40 = vmul.f32 %v1906_v28, %v2701_v49 }
 0x2c5   :  { %1591 = vst.msk [vmem:[%s2774_s2 + $0xf8] sm:$0x1] %vm1590_vm0, %v1558_v40 }

</bundles_post_ra>
